<compile_context>
chip_gen: v7x
topology: tpu7x:2x2x1
jax: 0.10.0
libtpu: 0.0.40
codegen_flags: <defaults>
</compile_context>

<pallas_src>
import math
import functools

import numpy as np
import jax
import jax.numpy as jnp
from jax.experimental import pallas as pl
from jax.experimental.pallas import tpu as pltpu

EPS = 1e-5  # PyTorch nn.LayerNorm default eps

_BLOCK_PARAM_NAMES = ('ln1w', 'ln1b', 'wq', 'bq', 'wk', 'bk', 'wv', 'bv',
                      'wo', 'bo', 'ln2w', 'ln2b', 'w1', 'b1', 'w2', 'b2')


# ----------------------------------------------------------------------------
# Fused kernel
# ----------------------------------------------------------------------------
def _layernorm(x, w, b):
    mu = jnp.mean(x, axis=-1, keepdims=True)
    var = jnp.mean((x - mu) ** 2, axis=-1, keepdims=True)
    return (x - mu) * jax.lax.rsqrt(var + EPS) * w + b


def _transformer_block(x, neg_mask,
                       ln1w, ln1b, wq, bq, wk, bk, wv, bv, wo, bo,
                       ln2w, ln2b, w1, b1, w2, b2, *, inv_sqrt_dk):
    # --- LayerNorm 1 + Attention ---
    xn = _layernorm(x, ln1w, ln1b)
    q = jnp.einsum('bse,ef->bsf', xn, wq, preferred_element_type=jnp.float32) + bq
    k = jnp.einsum('bse,ef->bsf', xn, wk, preferred_element_type=jnp.float32) + bk
    v = jnp.einsum('bse,ef->bsf', xn, wv, preferred_element_type=jnp.float32) + bv

    w = jnp.einsum('bqe,bke->bqk', q, k,
                   preferred_element_type=jnp.float32) * inv_sqrt_dk
    w = jnp.where(neg_mask, -1000000000.0, w)       # mask key columns

    # NOTE: reference does F.softmax(weights, dim=1) -> softmax over the QUERY axis.
    w = w - jnp.max(w, axis=1, keepdims=True)
    ew = jnp.exp(w)
    attn = ew * pl.reciprocal(jnp.sum(ew, axis=1, keepdims=True), approx=True)

    out = jnp.einsum('bqk,bke->bqe', attn, v, preferred_element_type=jnp.float32)
    out = jnp.einsum('bse,ef->bsf', out, wo, preferred_element_type=jnp.float32) + bo
    x2 = x + out                                    # residual (dropout = identity)

    # --- LayerNorm 2 + FeedForward ---
    xn2 = _layernorm(x2, ln2w, ln2b)
    h = jnp.einsum('bse,ef->bsf', xn2, w1, preferred_element_type=jnp.float32) + b1
    h = jnp.maximum(h, 0.0)
    ff = jnp.einsum('bsf,fe->bse', h, w2, preferred_element_type=jnp.float32) + b2
    return x2 + ff                                  # residual (dropout = identity)


def fused_forward_kernel(*refs, num_classes, scale, inv_sqrt_dk):
    ids_ref, mask_ref, emb_ref, pe_ref = refs[0:4]
    blk1_refs = refs[4:20]
    blk2_refs = refs[20:36]
    wct_ref = refs[36]                              # (C, 1, S, E)
    bc_ref = refs[37]                               # (C, 1, 1)
    o_ref = refs[38]                                # (B, 1, C)

    B, S, _ = ids_ref.shape
    V, E = emb_ref.shape
    C = num_classes

    # ---- Embedder: gather expressed as one-hot @ table (single MXU matmul) ----
    ids = ids_ref[...]                              # (B, S, 1) int32
    iota_v = jax.lax.broadcasted_iota(jnp.int32, (B, S, V), 2)
    onehot = (iota_v == ids).astype(jnp.float32)    # (B, S, V)
    x = jnp.einsum('bsv,ve->bse', onehot, emb_ref[...],
                   preferred_element_type=jnp.float32)   # (B, S, E)

    # ---- PositionalEncoder: sqrt(E) * x + pe ----
    x = scale * x + pe_ref[...]

    # ---- 2 x TransformerBlock ----
    neg_mask = mask_ref[...] == 0                   # (B, 1, S)
    x = _transformer_block(x, neg_mask, *(r[...] for r in blk1_refs),
                           inv_sqrt_dk=inv_sqrt_dk)
    x = _transformer_block(x, neg_mask, *(r[...] for r in blk2_refs),
                           inv_sqrt_dk=inv_sqrt_dk)

    # ---- ClassificationHead ----
    # logits[b, c] = sum_{s,e} x[b,s,e] * Wc[c,0,s,e] + bc[c]
    # (multiply-reduce per class: keeps the flatten+matmul fused without any
    #  in-kernel (B,S,E)->(B,S*E) relayout)
    logits = []
    for c in range(C):
        prod = x * wct_ref[c]                                           # (B,S,E)
        lc = jnp.sum(prod, axis=1, keepdims=True)                       # (B,1,E)
        lc = jnp.sum(lc, axis=2, keepdims=True)                         # (B,1,1)
        logits.append(lc + bc_ref[c])

    # softmax over classes (F.softmax default dim=1 for 2-D input)
    m = logits[0]
    for c in range(1, C):
        m = jnp.maximum(m, logits[c])
    exps = [jnp.exp(l - m) for l in logits]
    denom = exps[0]
    for c in range(1, C):
        denom = denom + exps[c]
    inv = pl.reciprocal(denom, approx=True)                             # (B,1,1)

    cls_iota = jax.lax.broadcasted_iota(jnp.int32, (B, 1, C), 2)
    out = jnp.zeros((B, 1, C), jnp.float32)
    for c in range(C):
        out = out + jnp.where(cls_iota == c, exps[c] * inv, 0.0)
    o_ref[...] = out


# ----------------------------------------------------------------------------
# Wrapper (single pallas_call; whole problem fits VMEM -> full-array blocks)
# ----------------------------------------------------------------------------
def _full_spec(a):
    shp = a.shape
    return pl.BlockSpec(shp, lambda i, _n=len(shp): (0,) * _n)


def transformer_forward(ids, mask, params, embed_size):
    B, S = ids.shape
    V, E = params['emb'].shape
    C = params['bc'].shape[-1]

    # Layout plumbing done outside the kernel (free XLA reshapes/transposes).
    ids3 = ids.astype(jnp.int32).reshape(B, S, 1)
    mask3 = mask.astype(jnp.int32).reshape(B, 1, S)
    wc_t = jnp.transpose(params['wc'].reshape(S, E, C), (2, 0, 1)).reshape(C, 1, S, E)
    bc3 = params['bc'].reshape(C, 1, 1)

    block_args = []
    for blk in ('block1', 'block2'):
        block_args += [params[blk][n] for n in _BLOCK_PARAM_NAMES]

    args = [ids3, mask3, params['emb'], params['pe']] + block_args + [wc_t, bc3]

    kernel = functools.partial(
        fused_forward_kernel,
        num_classes=C,
        scale=math.sqrt(embed_size),
        inv_sqrt_dk=1.0 / math.sqrt(embed_size))

    out = pl.pallas_call(
        kernel,
        out_shape=jax.ShapeDtypeStruct((B, 1, C), jnp.float32),
        grid=(1,),
        in_specs=[_full_spec(a) for a in args],
        out_specs=pl.BlockSpec((B, 1, C), lambda i: (0, 0, 0)),
        compiler_params=pltpu.CompilerParams(vmem_limit_bytes=32 * 1024 * 1024),
    )(*args)
    return out.reshape(B, C)


# ----------------------------------------------------------------------------
# Deterministic parameter init + pure-JAX reference for verification
# ----------------------------------------------------------------------------
def make_pe_table(max_seq_len, embed_size):
    pe = np.zeros((max_seq_len, embed_size), dtype=np.float32)
    for pos in range(max_seq_len):
        for i in range(0, embed_size, 2):
            pe[pos, i] = math.sin(pos / 10000 ** (2 * i / embed_size))
            pe[pos, i + 1] = math.cos(pos / 10000 ** (2 * i / embed_size))
    return jnp.asarray(pe)[None]                    # (1, S, E)


def init_block_params(key, E, F):
    ks = jax.random.split(key, 12)
    n = lambda k, s, sc: sc * jax.random.normal(k, s, jnp.float32)
    return dict(
        ln1w=1.0 + n(ks[0], (1, E), 0.1), ln1b=n(ks[1], (1, E), 0.1),
        wq=n(ks[2], (E, E), 0.1), bq=n(ks[3], (1, E), 0.01),
        wk=n(ks[4], (E, E), 0.1), bk=n(ks[5], (1, E), 0.01),
        wv=n(ks[6], (E, E), 0.1), bv=n(ks[7], (1, E), 0.01),
        wo=n(ks[8], (E, E), 0.1), bo=n(ks[9], (1, E), 0.01),
        ln2w=1.0 + n(ks[10], (1, E), 0.1), ln2b=n(ks[11], (1, E), 0.1),
        w1=n(jax.random.fold_in(key, 100), (E, F), 0.1),
        b1=n(jax.random.fold_in(key, 101), (1, F), 0.01),
        w2=n(jax.random.fold_in(key, 102), (F, E), 0.1),
        b2=n(jax.random.fold_in(key, 103), (1, E), 0.01),
    )


def init_params(key, n_vocab, E, S, F, C):
    k_emb, k_b1, k_b2, k_head = jax.random.split(key, 4)
    emb = 0.1 * jax.random.normal(k_emb, (n_vocab, E), jnp.float32)
    emb = emb.at[n_vocab - 1].set(0.0)              # padding_idx = n_vocab - 1
    return dict(
        emb=emb,
        pe=make_pe_table(S, E),
        block1=init_block_params(k_b1, E, F),
        block2=init_block_params(k_b2, E, F),
        wc=0.05 * jax.random.normal(k_head, (S * E, C), jnp.float32),
        bc=0.01 * jax.random.normal(jax.random.fold_in(k_head, 1), (1, C), jnp.float32),
    )


def ref_forward(ids, mask, params, E):
    hi = jax.lax.Precision.HIGHEST

    def ln(x, w, b):
        mu = x.mean(-1, keepdims=True)
        var = ((x - mu) ** 2).mean(-1, keepdims=True)
        return (x - mu) / jnp.sqrt(var + EPS) * w + b

    def block(x, p):
        xn = ln(x, p['ln1w'], p['ln1b'])
        q = jnp.einsum('bse,ef->bsf', xn, p['wq'], precision=hi) + p['bq']
        k = jnp.einsum('bse,ef->bsf', xn, p['wk'], precision=hi) + p['bk']
        v = jnp.einsum('bse,ef->bsf', xn, p['wv'], precision=hi) + p['bv']
        w = jnp.einsum('bqe,bke->bqk', q, k, precision=hi) / math.sqrt(E)
        w = jnp.where(mask[:, None, :] == 0, -1000000000.0, w)
        a = jax.nn.softmax(w, axis=1)
        o = jnp.einsum('bqk,bke->bqe', a, v, precision=hi)
        o = jnp.einsum('bse,ef->bsf', o, p['wo'], precision=hi) + p['bo']
        x2 = x + o
        xn2 = ln(x2, p['ln2w'], p['ln2b'])
        h = jax.nn.relu(jnp.einsum('bse,ef->bsf', xn2, p['w1'], precision=hi) + p['b1'])
        return x2 + jnp.einsum('bsf,fe->bse', h, p['w2'], precision=hi) + p['b2']

    x = math.sqrt(E) * params['emb'][ids] + params['pe']
    x = block(x, params['block1'])
    x = block(x, params['block2'])
    xflat = x.reshape(x.shape[0], -1)
    logits = jnp.dot(xflat, params['wc'], precision=hi) + params['bc']
    return jax.nn.softmax(logits, axis=1)


# ----------------------------------------------------------------------------
if __name__ == "__main__":
    # Small config consistent with the module's forward.
    N_VOCAB, EMBED, SEQ, D_FF, N_CLASSES, BATCH = 64, 32, 8, 64, 2, 2

    key = jax.random.PRNGKey(0)
    params = init_params(key, N_VOCAB, EMBED, SEQ, D_FF, N_CLASSES)

    # Token ids (last tokens of row 1 are the padding index) and matching mask.
    ids = jax.random.randint(jax.random.fold_in(key, 7), (BATCH, SEQ), 0, N_VOCAB - 1)
    ids = ids.at[1, 6:].set(N_VOCAB - 1)
    mask = jnp.ones((BATCH, SEQ), jnp.int32).at[1, 6:].set(0)

    out = transformer_forward(ids, mask, params, EMBED)
    out = jax.block_until_ready(out)

    ref = ref_forward(ids, mask, params, EMBED)

    assert out.shape == (BATCH, N_CLASSES)
    assert bool(jnp.all(jnp.isfinite(out)))
    assert bool(jnp.allclose(jnp.sum(out, axis=1), 1.0, atol=2e-3))
    # approx-reciprocal softmax => slightly looser tolerance than exact-divide version
    assert bool(jnp.allclose(out, ref, atol=5e-3)), (out, ref)

    print("KERNEL_OK")
</pallas_src>

<mosaic_0001>
module attributes {stable_mosaic.version = 11 : i64} {
  func.func @fused_forward_kernel(%arg0: i32, %arg1: memref<2x8x1xi32, #tpu.memory_space<vmem>>, %arg2: memref<2x1x8xi32, #tpu.memory_space<vmem>>, %arg3: memref<64x32xf32, #tpu.memory_space<vmem>>, %arg4: memref<1x8x32xf32, #tpu.memory_space<vmem>>, %arg5: memref<1x32xf32, #tpu.memory_space<vmem>>, %arg6: memref<1x32xf32, #tpu.memory_space<vmem>>, %arg7: memref<32x32xf32, #tpu.memory_space<vmem>>, %arg8: memref<1x32xf32, #tpu.memory_space<vmem>>, %arg9: memref<32x32xf32, #tpu.memory_space<vmem>>, %arg10: memref<1x32xf32, #tpu.memory_space<vmem>>, %arg11: memref<32x32xf32, #tpu.memory_space<vmem>>, %arg12: memref<1x32xf32, #tpu.memory_space<vmem>>, %arg13: memref<32x32xf32, #tpu.memory_space<vmem>>, %arg14: memref<1x32xf32, #tpu.memory_space<vmem>>, %arg15: memref<1x32xf32, #tpu.memory_space<vmem>>, %arg16: memref<1x32xf32, #tpu.memory_space<vmem>>, %arg17: memref<32x64xf32, #tpu.memory_space<vmem>>, %arg18: memref<1x64xf32, #tpu.memory_space<vmem>>, %arg19: memref<64x32xf32, #tpu.memory_space<vmem>>, %arg20: memref<1x32xf32, #tpu.memory_space<vmem>>, %arg21: memref<1x32xf32, #tpu.memory_space<vmem>>, %arg22: memref<1x32xf32, #tpu.memory_space<vmem>>, %arg23: memref<32x32xf32, #tpu.memory_space<vmem>>, %arg24: memref<1x32xf32, #tpu.memory_space<vmem>>, %arg25: memref<32x32xf32, #tpu.memory_space<vmem>>, %arg26: memref<1x32xf32, #tpu.memory_space<vmem>>, %arg27: memref<32x32xf32, #tpu.memory_space<vmem>>, %arg28: memref<1x32xf32, #tpu.memory_space<vmem>>, %arg29: memref<32x32xf32, #tpu.memory_space<vmem>>, %arg30: memref<1x32xf32, #tpu.memory_space<vmem>>, %arg31: memref<1x32xf32, #tpu.memory_space<vmem>>, %arg32: memref<1x32xf32, #tpu.memory_space<vmem>>, %arg33: memref<32x64xf32, #tpu.memory_space<vmem>>, %arg34: memref<1x64xf32, #tpu.memory_space<vmem>>, %arg35: memref<64x32xf32, #tpu.memory_space<vmem>>, %arg36: memref<1x32xf32, #tpu.memory_space<vmem>>, %arg37: memref<2x1x8x32xf32, #tpu.memory_space<vmem>>, %arg38: memref<2x1x1xf32, #tpu.memory_space<vmem>>, %arg39: memref<2x1x2xf32, #tpu.memory_space<vmem>>) attributes {dimension_semantics = [#tpu.dimension_semantics<arbitrary>], iteration_bounds = array<i64: 1>, scalar_prefetch = 0 : i64, scratch_operands = 0 : i64, tpu.core_type = #tpu.core_type<tc>, window_params = [{pipeline_mode = #tpu.pipeline_mode<synchronous>, transform_indices = @transform_0, window_bounds = array<i64: 2, 8, 1>}, {pipeline_mode = #tpu.pipeline_mode<synchronous>, transform_indices = @transform_1, window_bounds = array<i64: 2, 1, 8>}, {pipeline_mode = #tpu.pipeline_mode<synchronous>, transform_indices = @transform_2, window_bounds = array<i64: 64, 32>}, {pipeline_mode = #tpu.pipeline_mode<synchronous>, transform_indices = @transform_3, window_bounds = array<i64: 1, 8, 32>}, {pipeline_mode = #tpu.pipeline_mode<synchronous>, transform_indices = @transform_4, window_bounds = array<i64: 1, 32>}, {pipeline_mode = #tpu.pipeline_mode<synchronous>, transform_indices = @transform_5, window_bounds = array<i64: 1, 32>}, {pipeline_mode = #tpu.pipeline_mode<synchronous>, transform_indices = @transform_6, window_bounds = array<i64: 32, 32>}, {pipeline_mode = #tpu.pipeline_mode<synchronous>, transform_indices = @transform_7, window_bounds = array<i64: 1, 32>}, {pipeline_mode = #tpu.pipeline_mode<synchronous>, transform_indices = @transform_8, window_bounds = array<i64: 32, 32>}, {pipeline_mode = #tpu.pipeline_mode<synchronous>, transform_indices = @transform_9, window_bounds = array<i64: 1, 32>}, {pipeline_mode = #tpu.pipeline_mode<synchronous>, transform_indices = @transform_10, window_bounds = array<i64: 32, 32>}, {pipeline_mode = #tpu.pipeline_mode<synchronous>, transform_indices = @transform_11, window_bounds = array<i64: 1, 32>}, {pipeline_mode = #tpu.pipeline_mode<synchronous>, transform_indices = @transform_12, window_bounds = array<i64: 32, 32>}, {pipeline_mode = #tpu.pipeline_mode<synchronous>, transform_indices = @transform_13, window_bounds = array<i64: 1, 32>}, {pipeline_mode = #tpu.pipeline_mode<synchronous>, transform_indices = @transform_14, window_bounds = array<i64: 1, 32>}, {pipeline_mode = #tpu.pipeline_mode<synchronous>, transform_indices = @transform_15, window_bounds = array<i64: 1, 32>}, {pipeline_mode = #tpu.pipeline_mode<synchronous>, transform_indices = @transform_16, window_bounds = array<i64: 32, 64>}, {pipeline_mode = #tpu.pipeline_mode<synchronous>, transform_indices = @transform_17, window_bounds = array<i64: 1, 64>}, {pipeline_mode = #tpu.pipeline_mode<synchronous>, transform_indices = @transform_18, window_bounds = array<i64: 64, 32>}, {pipeline_mode = #tpu.pipeline_mode<synchronous>, transform_indices = @transform_19, window_bounds = array<i64: 1, 32>}, {pipeline_mode = #tpu.pipeline_mode<synchronous>, transform_indices = @transform_20, window_bounds = array<i64: 1, 32>}, {pipeline_mode = #tpu.pipeline_mode<synchronous>, transform_indices = @transform_21, window_bounds = array<i64: 1, 32>}, {pipeline_mode = #tpu.pipeline_mode<synchronous>, transform_indices = @transform_22, window_bounds = array<i64: 32, 32>}, {pipeline_mode = #tpu.pipeline_mode<synchronous>, transform_indices = @transform_23, window_bounds = array<i64: 1, 32>}, {pipeline_mode = #tpu.pipeline_mode<synchronous>, transform_indices = @transform_24, window_bounds = array<i64: 32, 32>}, {pipeline_mode = #tpu.pipeline_mode<synchronous>, transform_indices = @transform_25, window_bounds = array<i64: 1, 32>}, {pipeline_mode = #tpu.pipeline_mode<synchronous>, transform_indices = @transform_26, window_bounds = array<i64: 32, 32>}, {pipeline_mode = #tpu.pipeline_mode<synchronous>, transform_indices = @transform_27, window_bounds = array<i64: 1, 32>}, {pipeline_mode = #tpu.pipeline_mode<synchronous>, transform_indices = @transform_28, window_bounds = array<i64: 32, 32>}, {pipeline_mode = #tpu.pipeline_mode<synchronous>, transform_indices = @transform_29, window_bounds = array<i64: 1, 32>}, {pipeline_mode = #tpu.pipeline_mode<synchronous>, transform_indices = @transform_30, window_bounds = array<i64: 1, 32>}, {pipeline_mode = #tpu.pipeline_mode<synchronous>, transform_indices = @transform_31, window_bounds = array<i64: 1, 32>}, {pipeline_mode = #tpu.pipeline_mode<synchronous>, transform_indices = @transform_32, window_bounds = array<i64: 32, 64>}, {pipeline_mode = #tpu.pipeline_mode<synchronous>, transform_indices = @transform_33, window_bounds = array<i64: 1, 64>}, {pipeline_mode = #tpu.pipeline_mode<synchronous>, transform_indices = @transform_34, window_bounds = array<i64: 64, 32>}, {pipeline_mode = #tpu.pipeline_mode<synchronous>, transform_indices = @transform_35, window_bounds = array<i64: 1, 32>}, {pipeline_mode = #tpu.pipeline_mode<synchronous>, transform_indices = @transform_36, window_bounds = array<i64: 2, 1, 8, 32>}, {pipeline_mode = #tpu.pipeline_mode<synchronous>, transform_indices = @transform_37, window_bounds = array<i64: 2, 1, 1>}, {pipeline_mode = #tpu.pipeline_mode<synchronous>, transform_indices = @transform_38, window_bounds = array<i64: 2, 1, 2>}]} {
    %c0 = arith.constant 0 : index
    %c0_0 = arith.constant 0 : index
    %c0_1 = arith.constant 0 : index
    %0 = vector.load %arg1[%c0, %c0_0, %c0_1] : memref<2x8x1xi32, #tpu.memory_space<vmem>>, vector<2x8x1xi32>
    %1 = tpu.iota {dimensions = array<i32: 2>} : vector<2x8x64xi32>
    %2 = vector.broadcast %0 : vector<2x8x1xi32> to vector<2x8x64xi32>
    %3 = arith.cmpi eq, %1, %2 : vector<2x8x64xi32>
    %4 = arith.extui %3 : vector<2x8x64xi1> to vector<2x8x64xi32>
    %5 = arith.sitofp %4 : vector<2x8x64xi32> to vector<2x8x64xf32>
    %c0_2 = arith.constant 0 : index
    %c0_3 = arith.constant 0 : index
    %6 = vector.load %arg3[%c0_2, %c0_3] : memref<64x32xf32, #tpu.memory_space<vmem>>, vector<64x32xf32>
    "tpu.trace_start"() <{level = 10 : i32, message = "bsv,ve->bse"}> : () -> ()
    %cst = arith.constant dense<0.000000e+00> : vector<2x8x32xf32>
    %7 = tpu.matmul %5, %6, %cst {dimension_numbers = #tpu.dot_dimension_numbers<[2], [0], [0, 1], [1], [0, 0, 0, 1, 1, 1], [], []>} : vector<2x8x64xf32>, vector<64x32xf32>, vector<2x8x32xf32> -> vector<2x8x32xf32>
    "tpu.trace_stop"() : () -> ()
    %cst_4 = arith.constant 5.65685415 : f32
    %8 = vector.broadcast %cst_4 : f32 to vector<2x8x32xf32>
    %9 = arith.mulf %8, %7 : vector<2x8x32xf32>
    %c0_5 = arith.constant 0 : index
    %c0_6 = arith.constant 0 : index
    %c0_7 = arith.constant 0 : index
    %10 = vector.load %arg4[%c0_5, %c0_6, %c0_7] : memref<1x8x32xf32, #tpu.memory_space<vmem>>, vector<1x8x32xf32>
    %11 = vector.broadcast %10 : vector<1x8x32xf32> to vector<2x8x32xf32>
    %12 = arith.addf %9, %11 : vector<2x8x32xf32>
    %c0_8 = arith.constant 0 : index
    %c0_9 = arith.constant 0 : index
    %c0_10 = arith.constant 0 : index
    %13 = vector.load %arg2[%c0_8, %c0_9, %c0_10] : memref<2x1x8xi32, #tpu.memory_space<vmem>>, vector<2x1x8xi32>
    %c0_i32 = arith.constant 0 : i32
    %14 = vector.broadcast %c0_i32 : i32 to vector<2x1x8xi32>
    %15 = arith.cmpi eq, %13, %14 : vector<2x1x8xi32>
    %c0_11 = arith.constant 0 : index
    %c0_12 = arith.constant 0 : index
    %16 = vector.load %arg5[%c0_11, %c0_12] : memref<1x32xf32, #tpu.memory_space<vmem>>, vector<1x32xf32>
    %c0_13 = arith.constant 0 : index
    %c0_14 = arith.constant 0 : index
    %17 = vector.load %arg6[%c0_13, %c0_14] : memref<1x32xf32, #tpu.memory_space<vmem>>, vector<1x32xf32>
    %c0_15 = arith.constant 0 : index
    %c0_16 = arith.constant 0 : index
    %18 = vector.load %arg7[%c0_15, %c0_16] : memref<32x32xf32, #tpu.memory_space<vmem>>, vector<32x32xf32>
    %c0_17 = arith.constant 0 : index
    %c0_18 = arith.constant 0 : index
    %19 = vector.load %arg8[%c0_17, %c0_18] : memref<1x32xf32, #tpu.memory_space<vmem>>, vector<1x32xf32>
    %c0_19 = arith.constant 0 : index
    %c0_20 = arith.constant 0 : index
    %20 = vector.load %arg9[%c0_19, %c0_20] : memref<32x32xf32, #tpu.memory_space<vmem>>, vector<32x32xf32>
    %c0_21 = arith.constant 0 : index
    %c0_22 = arith.constant 0 : index
    %21 = vector.load %arg10[%c0_21, %c0_22] : memref<1x32xf32, #tpu.memory_space<vmem>>, vector<1x32xf32>
    %c0_23 = arith.constant 0 : index
    %c0_24 = arith.constant 0 : index
    %22 = vector.load %arg11[%c0_23, %c0_24] : memref<32x32xf32, #tpu.memory_space<vmem>>, vector<32x32xf32>
    %c0_25 = arith.constant 0 : index
    %c0_26 = arith.constant 0 : index
    %23 = vector.load %arg12[%c0_25, %c0_26] : memref<1x32xf32, #tpu.memory_space<vmem>>, vector<1x32xf32>
    %c0_27 = arith.constant 0 : index
    %c0_28 = arith.constant 0 : index
    %24 = vector.load %arg13[%c0_27, %c0_28] : memref<32x32xf32, #tpu.memory_space<vmem>>, vector<32x32xf32>
    %c0_29 = arith.constant 0 : index
    %c0_30 = arith.constant 0 : index
    %25 = vector.load %arg14[%c0_29, %c0_30] : memref<1x32xf32, #tpu.memory_space<vmem>>, vector<1x32xf32>
    %c0_31 = arith.constant 0 : index
    %c0_32 = arith.constant 0 : index
    %26 = vector.load %arg15[%c0_31, %c0_32] : memref<1x32xf32, #tpu.memory_space<vmem>>, vector<1x32xf32>
    %c0_33 = arith.constant 0 : index
    %c0_34 = arith.constant 0 : index
    %27 = vector.load %arg16[%c0_33, %c0_34] : memref<1x32xf32, #tpu.memory_space<vmem>>, vector<1x32xf32>
    %c0_35 = arith.constant 0 : index
    %c0_36 = arith.constant 0 : index
    %28 = vector.load %arg17[%c0_35, %c0_36] : memref<32x64xf32, #tpu.memory_space<vmem>>, vector<32x64xf32>
    %c0_37 = arith.constant 0 : index
    %c0_38 = arith.constant 0 : index
    %29 = vector.load %arg18[%c0_37, %c0_38] : memref<1x64xf32, #tpu.memory_space<vmem>>, vector<1x64xf32>
    %c0_39 = arith.constant 0 : index
    %c0_40 = arith.constant 0 : index
    %30 = vector.load %arg19[%c0_39, %c0_40] : memref<64x32xf32, #tpu.memory_space<vmem>>, vector<64x32xf32>
    %c0_41 = arith.constant 0 : index
    %c0_42 = arith.constant 0 : index
    %31 = vector.load %arg20[%c0_41, %c0_42] : memref<1x32xf32, #tpu.memory_space<vmem>>, vector<1x32xf32>
    %cst_43 = arith.constant dense<0.000000e+00> : vector<2x8xf32>
    %32 = vector.multi_reduction <add>, %12, %cst_43 [2] : vector<2x8x32xf32> to vector<2x8xf32>
    %33 = vector.shape_cast %32 : vector<2x8xf32> to vector<2x8x1xf32>
    %cst_44 = arith.constant 3.200000e+01 : f32
    %34 = vector.broadcast %cst_44 : f32 to vector<2x8x1xf32>
    %35 = arith.divf %33, %34 : vector<2x8x1xf32>
    %36 = vector.broadcast %35 : vector<2x8x1xf32> to vector<2x8x32xf32>
    %37 = arith.subf %12, %36 : vector<2x8x32xf32>
    %38 = arith.mulf %37, %37 : vector<2x8x32xf32>
    %cst_45 = arith.constant dense<0.000000e+00> : vector<2x8xf32>
    %39 = vector.multi_reduction <add>, %38, %cst_45 [2] : vector<2x8x32xf32> to vector<2x8xf32>
    %40 = vector.shape_cast %39 : vector<2x8xf32> to vector<2x8x1xf32>
    %cst_46 = arith.constant 3.200000e+01 : f32
    %41 = vector.broadcast %cst_46 : f32 to vector<2x8x1xf32>
    %42 = arith.divf %40, %41 : vector<2x8x1xf32>
    %43 = vector.broadcast %35 : vector<2x8x1xf32> to vector<2x8x32xf32>
    %44 = arith.subf %12, %43 : vector<2x8x32xf32>
    %cst_47 = arith.constant 9.99999974E-6 : f32
    %45 = vector.broadcast %cst_47 : f32 to vector<2x8x1xf32>
    %46 = arith.addf %42, %45 : vector<2x8x1xf32>
    %47 = math.rsqrt %46 : vector<2x8x1xf32>
    %48 = vector.broadcast %47 : vector<2x8x1xf32> to vector<2x8x32xf32>
    %49 = arith.mulf %44, %48 : vector<2x8x32xf32>
    %50 = vector.shape_cast %16 : vector<1x32xf32> to vector<1x1x32xf32>
    %51 = vector.broadcast %50 : vector<1x1x32xf32> to vector<2x8x32xf32>
    %52 = arith.mulf %49, %51 : vector<2x8x32xf32>
    %53 = vector.shape_cast %17 : vector<1x32xf32> to vector<1x1x32xf32>
    %54 = vector.broadcast %53 : vector<1x1x32xf32> to vector<2x8x32xf32>
    %55 = arith.addf %52, %54 : vector<2x8x32xf32>
    "tpu.trace_start"() <{level = 10 : i32, message = "bse,ef->bsf"}> : () -> ()
    %cst_48 = arith.constant dense<0.000000e+00> : vector<2x8x32xf32>
    %56 = tpu.matmul %55, %18, %cst_48 {dimension_numbers = #tpu.dot_dimension_numbers<[2], [0], [0, 1], [1], [0, 0, 0, 1, 1, 1], [], []>} : vector<2x8x32xf32>, vector<32x32xf32>, vector<2x8x32xf32> -> vector<2x8x32xf32>
    "tpu.trace_stop"() : () -> ()
    %57 = vector.shape_cast %19 : vector<1x32xf32> to vector<1x1x32xf32>
    %58 = vector.broadcast %57 : vector<1x1x32xf32> to vector<2x8x32xf32>
    %59 = arith.addf %56, %58 : vector<2x8x32xf32>
    "tpu.trace_start"() <{level = 10 : i32, message = "bse,ef->bsf"}> : () -> ()
    %cst_49 = arith.constant dense<0.000000e+00> : vector<2x8x32xf32>
    %60 = tpu.matmul %55, %20, %cst_49 {dimension_numbers = #tpu.dot_dimension_numbers<[2], [0], [0, 1], [1], [0, 0, 0, 1, 1, 1], [], []>} : vector<2x8x32xf32>, vector<32x32xf32>, vector<2x8x32xf32> -> vector<2x8x32xf32>
    "tpu.trace_stop"() : () -> ()
    %61 = vector.shape_cast %21 : vector<1x32xf32> to vector<1x1x32xf32>
    %62 = vector.broadcast %61 : vector<1x1x32xf32> to vector<2x8x32xf32>
    %63 = arith.addf %60, %62 : vector<2x8x32xf32>
    "tpu.trace_start"() <{level = 10 : i32, message = "bse,ef->bsf"}> : () -> ()
    %cst_50 = arith.constant dense<0.000000e+00> : vector<2x8x32xf32>
    %64 = tpu.matmul %55, %22, %cst_50 {dimension_numbers = #tpu.dot_dimension_numbers<[2], [0], [0, 1], [1], [0, 0, 0, 1, 1, 1], [], []>} : vector<2x8x32xf32>, vector<32x32xf32>, vector<2x8x32xf32> -> vector<2x8x32xf32>
    "tpu.trace_stop"() : () -> ()
    %65 = vector.shape_cast %23 : vector<1x32xf32> to vector<1x1x32xf32>
    %66 = vector.broadcast %65 : vector<1x1x32xf32> to vector<2x8x32xf32>
    %67 = arith.addf %64, %66 : vector<2x8x32xf32>
    "tpu.trace_start"() <{level = 10 : i32, message = "bqe,bke->bqk"}> : () -> ()
    %cst_51 = arith.constant dense<0.000000e+00> : vector<2x8x8xf32>
    %68 = tpu.matmul %59, %63, %cst_51 {dimension_numbers = #tpu.dot_dimension_numbers<[2], [2], [1], [1], [0, 0, 0, 1, 1, 1], [0], [0]>} : vector<2x8x32xf32>, vector<2x8x32xf32>, vector<2x8x8xf32> -> vector<2x8x8xf32>
    "tpu.trace_stop"() : () -> ()
    %cst_52 = arith.constant 0.176776692 : f32
    %69 = vector.broadcast %cst_52 : f32 to vector<2x8x8xf32>
    %70 = arith.mulf %68, %69 : vector<2x8x8xf32>
    %cst_53 = arith.constant -1.000000e+09 : f32
    %71 = vector.shape_cast %15 : vector<2x1x8xi1> to vector<2x1x8xi1>
    %72 = vector.broadcast %71 : vector<2x1x8xi1> to vector<2x8x8xi1>
    %73 = vector.broadcast %cst_53 : f32 to vector<2x8x8xf32>
    %74 = arith.select %72, %73, %70 : vector<2x8x8xi1>, vector<2x8x8xf32>
    %cst_54 = arith.constant dense<0xFF800000> : vector<2x8xf32>
    %75 = vector.multi_reduction <maximumf>, %74, %cst_54 [1] : vector<2x8x8xf32> to vector<2x8xf32>
    %76 = vector.shape_cast %75 : vector<2x8xf32> to vector<2x1x8xf32>
    %77 = vector.broadcast %76 : vector<2x1x8xf32> to vector<2x8x8xf32>
    %78 = arith.subf %74, %77 : vector<2x8x8xf32>
    %79 = math.exp %78 : vector<2x8x8xf32>
    %cst_55 = arith.constant dense<0.000000e+00> : vector<2x8xf32>
    %80 = vector.multi_reduction <add>, %79, %cst_55 [1] : vector<2x8x8xf32> to vector<2x8xf32>
    %81 = vector.shape_cast %80 : vector<2x8xf32> to vector<2x1x8xf32>
    %82 = tpu.reciprocal %81 {approx = true} : vector<2x1x8xf32> -> vector<2x1x8xf32>
    %83 = vector.broadcast %82 : vector<2x1x8xf32> to vector<2x8x8xf32>
    %84 = arith.mulf %79, %83 : vector<2x8x8xf32>
    "tpu.trace_start"() <{level = 10 : i32, message = "bqk,bke->bqe"}> : () -> ()
    %cst_56 = arith.constant dense<0.000000e+00> : vector<2x8x32xf32>
    %85 = tpu.matmul %84, %67, %cst_56 {dimension_numbers = #tpu.dot_dimension_numbers<[2], [1], [1], [2], [0, 0, 0, 1, 1, 2], [0], [0]>} : vector<2x8x8xf32>, vector<2x8x32xf32>, vector<2x8x32xf32> -> vector<2x8x32xf32>
    "tpu.trace_stop"() : () -> ()
    "tpu.trace_start"() <{level = 10 : i32, message = "bse,ef->bsf"}> : () -> ()
    %cst_57 = arith.constant dense<0.000000e+00> : vector<2x8x32xf32>
    %86 = tpu.matmul %85, %24, %cst_57 {dimension_numbers = #tpu.dot_dimension_numbers<[2], [0], [0, 1], [1], [0, 0, 0, 1, 1, 1], [], []>} : vector<2x8x32xf32>, vector<32x32xf32>, vector<2x8x32xf32> -> vector<2x8x32xf32>
    "tpu.trace_stop"() : () -> ()
    %87 = vector.shape_cast %25 : vector<1x32xf32> to vector<1x1x32xf32>
    %88 = vector.broadcast %87 : vector<1x1x32xf32> to vector<2x8x32xf32>
    %89 = arith.addf %86, %88 : vector<2x8x32xf32>
    %90 = arith.addf %12, %89 : vector<2x8x32xf32>
    %cst_58 = arith.constant dense<0.000000e+00> : vector<2x8xf32>
    %91 = vector.multi_reduction <add>, %90, %cst_58 [2] : vector<2x8x32xf32> to vector<2x8xf32>
    %92 = vector.shape_cast %91 : vector<2x8xf32> to vector<2x8x1xf32>
    %cst_59 = arith.constant 3.200000e+01 : f32
    %93 = vector.broadcast %cst_59 : f32 to vector<2x8x1xf32>
    %94 = arith.divf %92, %93 : vector<2x8x1xf32>
    %95 = vector.broadcast %94 : vector<2x8x1xf32> to vector<2x8x32xf32>
    %96 = arith.subf %90, %95 : vector<2x8x32xf32>
    %97 = arith.mulf %96, %96 : vector<2x8x32xf32>
    %cst_60 = arith.constant dense<0.000000e+00> : vector<2x8xf32>
    %98 = vector.multi_reduction <add>, %97, %cst_60 [2] : vector<2x8x32xf32> to vector<2x8xf32>
    %99 = vector.shape_cast %98 : vector<2x8xf32> to vector<2x8x1xf32>
    %cst_61 = arith.constant 3.200000e+01 : f32
    %100 = vector.broadcast %cst_61 : f32 to vector<2x8x1xf32>
    %101 = arith.divf %99, %100 : vector<2x8x1xf32>
    %102 = vector.broadcast %94 : vector<2x8x1xf32> to vector<2x8x32xf32>
    %103 = arith.subf %90, %102 : vector<2x8x32xf32>
    %cst_62 = arith.constant 9.99999974E-6 : f32
    %104 = vector.broadcast %cst_62 : f32 to vector<2x8x1xf32>
    %105 = arith.addf %101, %104 : vector<2x8x1xf32>
    %106 = math.rsqrt %105 : vector<2x8x1xf32>
    %107 = vector.broadcast %106 : vector<2x8x1xf32> to vector<2x8x32xf32>
    %108 = arith.mulf %103, %107 : vector<2x8x32xf32>
    %109 = vector.shape_cast %26 : vector<1x32xf32> to vector<1x1x32xf32>
    %110 = vector.broadcast %109 : vector<1x1x32xf32> to vector<2x8x32xf32>
    %111 = arith.mulf %108, %110 : vector<2x8x32xf32>
    %112 = vector.shape_cast %27 : vector<1x32xf32> to vector<1x1x32xf32>
    %113 = vector.broadcast %112 : vector<1x1x32xf32> to vector<2x8x32xf32>
    %114 = arith.addf %111, %113 : vector<2x8x32xf32>
    "tpu.trace_start"() <{level = 10 : i32, message = "bse,ef->bsf"}> : () -> ()
    %cst_63 = arith.constant dense<0.000000e+00> : vector<2x8x64xf32>
    %115 = tpu.matmul %114, %28, %cst_63 {dimension_numbers = #tpu.dot_dimension_numbers<[2], [0], [0, 1], [1], [0, 0, 0, 1, 1, 1], [], []>} : vector<2x8x32xf32>, vector<32x64xf32>, vector<2x8x64xf32> -> vector<2x8x64xf32>
    "tpu.trace_stop"() : () -> ()
    %116 = vector.shape_cast %29 : vector<1x64xf32> to vector<1x1x64xf32>
    %117 = vector.broadcast %116 : vector<1x1x64xf32> to vector<2x8x64xf32>
    %118 = arith.addf %115, %117 : vector<2x8x64xf32>
    %cst_64 = arith.constant 0.000000e+00 : f32
    %119 = vector.broadcast %cst_64 : f32 to vector<2x8x64xf32>
    %120 = arith.maximumf %118, %119 : vector<2x8x64xf32>
    "tpu.trace_start"() <{level = 10 : i32, message = "bsf,fe->bse"}> : () -> ()
    %cst_65 = arith.constant dense<0.000000e+00> : vector<2x8x32xf32>
    %121 = tpu.matmul %120, %30, %cst_65 {dimension_numbers = #tpu.dot_dimension_numbers<[2], [0], [0, 1], [1], [0, 0, 0, 1, 1, 1], [], []>} : vector<2x8x64xf32>, vector<64x32xf32>, vector<2x8x32xf32> -> vector<2x8x32xf32>
    "tpu.trace_stop"() : () -> ()
    %122 = vector.shape_cast %31 : vector<1x32xf32> to vector<1x1x32xf32>
    %123 = vector.broadcast %122 : vector<1x1x32xf32> to vector<2x8x32xf32>
    %124 = arith.addf %121, %123 : vector<2x8x32xf32>
    %125 = arith.addf %90, %124 : vector<2x8x32xf32>
    %c0_66 = arith.constant 0 : index
    %c0_67 = arith.constant 0 : index
    %126 = vector.load %arg21[%c0_66, %c0_67] : memref<1x32xf32, #tpu.memory_space<vmem>>, vector<1x32xf32>
    %c0_68 = arith.constant 0 : index
    %c0_69 = arith.constant 0 : index
    %127 = vector.load %arg22[%c0_68, %c0_69] : memref<1x32xf32, #tpu.memory_space<vmem>>, vector<1x32xf32>
    %c0_70 = arith.constant 0 : index
    %c0_71 = arith.constant 0 : index
    %128 = vector.load %arg23[%c0_70, %c0_71] : memref<32x32xf32, #tpu.memory_space<vmem>>, vector<32x32xf32>
    %c0_72 = arith.constant 0 : index
    %c0_73 = arith.constant 0 : index
    %129 = vector.load %arg24[%c0_72, %c0_73] : memref<1x32xf32, #tpu.memory_space<vmem>>, vector<1x32xf32>
    %c0_74 = arith.constant 0 : index
    %c0_75 = arith.constant 0 : index
    %130 = vector.load %arg25[%c0_74, %c0_75] : memref<32x32xf32, #tpu.memory_space<vmem>>, vector<32x32xf32>
    %c0_76 = arith.constant 0 : index
    %c0_77 = arith.constant 0 : index
    %131 = vector.load %arg26[%c0_76, %c0_77] : memref<1x32xf32, #tpu.memory_space<vmem>>, vector<1x32xf32>
    %c0_78 = arith.constant 0 : index
    %c0_79 = arith.constant 0 : index
    %132 = vector.load %arg27[%c0_78, %c0_79] : memref<32x32xf32, #tpu.memory_space<vmem>>, vector<32x32xf32>
    %c0_80 = arith.constant 0 : index
    %c0_81 = arith.constant 0 : index
    %133 = vector.load %arg28[%c0_80, %c0_81] : memref<1x32xf32, #tpu.memory_space<vmem>>, vector<1x32xf32>
    %c0_82 = arith.constant 0 : index
    %c0_83 = arith.constant 0 : index
    %134 = vector.load %arg29[%c0_82, %c0_83] : memref<32x32xf32, #tpu.memory_space<vmem>>, vector<32x32xf32>
    %c0_84 = arith.constant 0 : index
    %c0_85 = arith.constant 0 : index
    %135 = vector.load %arg30[%c0_84, %c0_85] : memref<1x32xf32, #tpu.memory_space<vmem>>, vector<1x32xf32>
    %c0_86 = arith.constant 0 : index
    %c0_87 = arith.constant 0 : index
    %136 = vector.load %arg31[%c0_86, %c0_87] : memref<1x32xf32, #tpu.memory_space<vmem>>, vector<1x32xf32>
    %c0_88 = arith.constant 0 : index
    %c0_89 = arith.constant 0 : index
    %137 = vector.load %arg32[%c0_88, %c0_89] : memref<1x32xf32, #tpu.memory_space<vmem>>, vector<1x32xf32>
    %c0_90 = arith.constant 0 : index
    %c0_91 = arith.constant 0 : index
    %138 = vector.load %arg33[%c0_90, %c0_91] : memref<32x64xf32, #tpu.memory_space<vmem>>, vector<32x64xf32>
    %c0_92 = arith.constant 0 : index
    %c0_93 = arith.constant 0 : index
    %139 = vector.load %arg34[%c0_92, %c0_93] : memref<1x64xf32, #tpu.memory_space<vmem>>, vector<1x64xf32>
    %c0_94 = arith.constant 0 : index
    %c0_95 = arith.constant 0 : index
    %140 = vector.load %arg35[%c0_94, %c0_95] : memref<64x32xf32, #tpu.memory_space<vmem>>, vector<64x32xf32>
    %c0_96 = arith.constant 0 : index
    %c0_97 = arith.constant 0 : index
    %141 = vector.load %arg36[%c0_96, %c0_97] : memref<1x32xf32, #tpu.memory_space<vmem>>, vector<1x32xf32>
    %cst_98 = arith.constant dense<0.000000e+00> : vector<2x8xf32>
    %142 = vector.multi_reduction <add>, %125, %cst_98 [2] : vector<2x8x32xf32> to vector<2x8xf32>
    %143 = vector.shape_cast %142 : vector<2x8xf32> to vector<2x8x1xf32>
    %cst_99 = arith.constant 3.200000e+01 : f32
    %144 = vector.broadcast %cst_99 : f32 to vector<2x8x1xf32>
    %145 = arith.divf %143, %144 : vector<2x8x1xf32>
    %146 = vector.broadcast %145 : vector<2x8x1xf32> to vector<2x8x32xf32>
    %147 = arith.subf %125, %146 : vector<2x8x32xf32>
    %148 = arith.mulf %147, %147 : vector<2x8x32xf32>
    %cst_100 = arith.constant dense<0.000000e+00> : vector<2x8xf32>
    %149 = vector.multi_reduction <add>, %148, %cst_100 [2] : vector<2x8x32xf32> to vector<2x8xf32>
    %150 = vector.shape_cast %149 : vector<2x8xf32> to vector<2x8x1xf32>
    %cst_101 = arith.constant 3.200000e+01 : f32
    %151 = vector.broadcast %cst_101 : f32 to vector<2x8x1xf32>
    %152 = arith.divf %150, %151 : vector<2x8x1xf32>
    %153 = vector.broadcast %145 : vector<2x8x1xf32> to vector<2x8x32xf32>
    %154 = arith.subf %125, %153 : vector<2x8x32xf32>
    %cst_102 = arith.constant 9.99999974E-6 : f32
    %155 = vector.broadcast %cst_102 : f32 to vector<2x8x1xf32>
    %156 = arith.addf %152, %155 : vector<2x8x1xf32>
    %157 = math.rsqrt %156 : vector<2x8x1xf32>
    %158 = vector.broadcast %157 : vector<2x8x1xf32> to vector<2x8x32xf32>
    %159 = arith.mulf %154, %158 : vector<2x8x32xf32>
    %160 = vector.shape_cast %126 : vector<1x32xf32> to vector<1x1x32xf32>
    %161 = vector.broadcast %160 : vector<1x1x32xf32> to vector<2x8x32xf32>
    %162 = arith.mulf %159, %161 : vector<2x8x32xf32>
    %163 = vector.shape_cast %127 : vector<1x32xf32> to vector<1x1x32xf32>
    %164 = vector.broadcast %163 : vector<1x1x32xf32> to vector<2x8x32xf32>
    %165 = arith.addf %162, %164 : vector<2x8x32xf32>
    "tpu.trace_start"() <{level = 10 : i32, message = "bse,ef->bsf"}> : () -> ()
    %cst_103 = arith.constant dense<0.000000e+00> : vector<2x8x32xf32>
    %166 = tpu.matmul %165, %128, %cst_103 {dimension_numbers = #tpu.dot_dimension_numbers<[2], [0], [0, 1], [1], [0, 0, 0, 1, 1, 1], [], []>} : vector<2x8x32xf32>, vector<32x32xf32>, vector<2x8x32xf32> -> vector<2x8x32xf32>
    "tpu.trace_stop"() : () -> ()
    %167 = vector.shape_cast %129 : vector<1x32xf32> to vector<1x1x32xf32>
    %168 = vector.broadcast %167 : vector<1x1x32xf32> to vector<2x8x32xf32>
    %169 = arith.addf %166, %168 : vector<2x8x32xf32>
    "tpu.trace_start"() <{level = 10 : i32, message = "bse,ef->bsf"}> : () -> ()
    %cst_104 = arith.constant dense<0.000000e+00> : vector<2x8x32xf32>
    %170 = tpu.matmul %165, %130, %cst_104 {dimension_numbers = #tpu.dot_dimension_numbers<[2], [0], [0, 1], [1], [0, 0, 0, 1, 1, 1], [], []>} : vector<2x8x32xf32>, vector<32x32xf32>, vector<2x8x32xf32> -> vector<2x8x32xf32>
    "tpu.trace_stop"() : () -> ()
    %171 = vector.shape_cast %131 : vector<1x32xf32> to vector<1x1x32xf32>
    %172 = vector.broadcast %171 : vector<1x1x32xf32> to vector<2x8x32xf32>
    %173 = arith.addf %170, %172 : vector<2x8x32xf32>
    "tpu.trace_start"() <{level = 10 : i32, message = "bse,ef->bsf"}> : () -> ()
    %cst_105 = arith.constant dense<0.000000e+00> : vector<2x8x32xf32>
    %174 = tpu.matmul %165, %132, %cst_105 {dimension_numbers = #tpu.dot_dimension_numbers<[2], [0], [0, 1], [1], [0, 0, 0, 1, 1, 1], [], []>} : vector<2x8x32xf32>, vector<32x32xf32>, vector<2x8x32xf32> -> vector<2x8x32xf32>
    "tpu.trace_stop"() : () -> ()
    %175 = vector.shape_cast %133 : vector<1x32xf32> to vector<1x1x32xf32>
    %176 = vector.broadcast %175 : vector<1x1x32xf32> to vector<2x8x32xf32>
    %177 = arith.addf %174, %176 : vector<2x8x32xf32>
    "tpu.trace_start"() <{level = 10 : i32, message = "bqe,bke->bqk"}> : () -> ()
    %cst_106 = arith.constant dense<0.000000e+00> : vector<2x8x8xf32>
    %178 = tpu.matmul %169, %173, %cst_106 {dimension_numbers = #tpu.dot_dimension_numbers<[2], [2], [1], [1], [0, 0, 0, 1, 1, 1], [0], [0]>} : vector<2x8x32xf32>, vector<2x8x32xf32>, vector<2x8x8xf32> -> vector<2x8x8xf32>
    "tpu.trace_stop"() : () -> ()
    %cst_107 = arith.constant 0.176776692 : f32
    %179 = vector.broadcast %cst_107 : f32 to vector<2x8x8xf32>
    %180 = arith.mulf %178, %179 : vector<2x8x8xf32>
    %cst_108 = arith.constant -1.000000e+09 : f32
    %181 = vector.shape_cast %15 : vector<2x1x8xi1> to vector<2x1x8xi1>
    %182 = vector.broadcast %181 : vector<2x1x8xi1> to vector<2x8x8xi1>
    %183 = vector.broadcast %cst_108 : f32 to vector<2x8x8xf32>
    %184 = arith.select %182, %183, %180 : vector<2x8x8xi1>, vector<2x8x8xf32>
    %cst_109 = arith.constant dense<0xFF800000> : vector<2x8xf32>
    %185 = vector.multi_reduction <maximumf>, %184, %cst_109 [1] : vector<2x8x8xf32> to vector<2x8xf32>
    %186 = vector.shape_cast %185 : vector<2x8xf32> to vector<2x1x8xf32>
    %187 = vector.broadcast %186 : vector<2x1x8xf32> to vector<2x8x8xf32>
    %188 = arith.subf %184, %187 : vector<2x8x8xf32>
    %189 = math.exp %188 : vector<2x8x8xf32>
    %cst_110 = arith.constant dense<0.000000e+00> : vector<2x8xf32>
    %190 = vector.multi_reduction <add>, %189, %cst_110 [1] : vector<2x8x8xf32> to vector<2x8xf32>
    %191 = vector.shape_cast %190 : vector<2x8xf32> to vector<2x1x8xf32>
    %192 = tpu.reciprocal %191 {approx = true} : vector<2x1x8xf32> -> vector<2x1x8xf32>
    %193 = vector.broadcast %192 : vector<2x1x8xf32> to vector<2x8x8xf32>
    %194 = arith.mulf %189, %193 : vector<2x8x8xf32>
    "tpu.trace_start"() <{level = 10 : i32, message = "bqk,bke->bqe"}> : () -> ()
    %cst_111 = arith.constant dense<0.000000e+00> : vector<2x8x32xf32>
    %195 = tpu.matmul %194, %177, %cst_111 {dimension_numbers = #tpu.dot_dimension_numbers<[2], [1], [1], [2], [0, 0, 0, 1, 1, 2], [0], [0]>} : vector<2x8x8xf32>, vector<2x8x32xf32>, vector<2x8x32xf32> -> vector<2x8x32xf32>
    "tpu.trace_stop"() : () -> ()
    "tpu.trace_start"() <{level = 10 : i32, message = "bse,ef->bsf"}> : () -> ()
    %cst_112 = arith.constant dense<0.000000e+00> : vector<2x8x32xf32>
    %196 = tpu.matmul %195, %134, %cst_112 {dimension_numbers = #tpu.dot_dimension_numbers<[2], [0], [0, 1], [1], [0, 0, 0, 1, 1, 1], [], []>} : vector<2x8x32xf32>, vector<32x32xf32>, vector<2x8x32xf32> -> vector<2x8x32xf32>
    "tpu.trace_stop"() : () -> ()
    %197 = vector.shape_cast %135 : vector<1x32xf32> to vector<1x1x32xf32>
    %198 = vector.broadcast %197 : vector<1x1x32xf32> to vector<2x8x32xf32>
    %199 = arith.addf %196, %198 : vector<2x8x32xf32>
    %200 = arith.addf %125, %199 : vector<2x8x32xf32>
    %cst_113 = arith.constant dense<0.000000e+00> : vector<2x8xf32>
    %201 = vector.multi_reduction <add>, %200, %cst_113 [2] : vector<2x8x32xf32> to vector<2x8xf32>
    %202 = vector.shape_cast %201 : vector<2x8xf32> to vector<2x8x1xf32>
    %cst_114 = arith.constant 3.200000e+01 : f32
    %203 = vector.broadcast %cst_114 : f32 to vector<2x8x1xf32>
    %204 = arith.divf %202, %203 : vector<2x8x1xf32>
    %205 = vector.broadcast %204 : vector<2x8x1xf32> to vector<2x8x32xf32>
    %206 = arith.subf %200, %205 : vector<2x8x32xf32>
    %207 = arith.mulf %206, %206 : vector<2x8x32xf32>
    %cst_115 = arith.constant dense<0.000000e+00> : vector<2x8xf32>
    %208 = vector.multi_reduction <add>, %207, %cst_115 [2] : vector<2x8x32xf32> to vector<2x8xf32>
    %209 = vector.shape_cast %208 : vector<2x8xf32> to vector<2x8x1xf32>
    %cst_116 = arith.constant 3.200000e+01 : f32
    %210 = vector.broadcast %cst_116 : f32 to vector<2x8x1xf32>
    %211 = arith.divf %209, %210 : vector<2x8x1xf32>
    %212 = vector.broadcast %204 : vector<2x8x1xf32> to vector<2x8x32xf32>
    %213 = arith.subf %200, %212 : vector<2x8x32xf32>
    %cst_117 = arith.constant 9.99999974E-6 : f32
    %214 = vector.broadcast %cst_117 : f32 to vector<2x8x1xf32>
    %215 = arith.addf %211, %214 : vector<2x8x1xf32>
    %216 = math.rsqrt %215 : vector<2x8x1xf32>
    %217 = vector.broadcast %216 : vector<2x8x1xf32> to vector<2x8x32xf32>
    %218 = arith.mulf %213, %217 : vector<2x8x32xf32>
    %219 = vector.shape_cast %136 : vector<1x32xf32> to vector<1x1x32xf32>
    %220 = vector.broadcast %219 : vector<1x1x32xf32> to vector<2x8x32xf32>
    %221 = arith.mulf %218, %220 : vector<2x8x32xf32>
    %222 = vector.shape_cast %137 : vector<1x32xf32> to vector<1x1x32xf32>
    %223 = vector.broadcast %222 : vector<1x1x32xf32> to vector<2x8x32xf32>
    %224 = arith.addf %221, %223 : vector<2x8x32xf32>
    "tpu.trace_start"() <{level = 10 : i32, message = "bse,ef->bsf"}> : () -> ()
    %cst_118 = arith.constant dense<0.000000e+00> : vector<2x8x64xf32>
    %225 = tpu.matmul %224, %138, %cst_118 {dimension_numbers = #tpu.dot_dimension_numbers<[2], [0], [0, 1], [1], [0, 0, 0, 1, 1, 1], [], []>} : vector<2x8x32xf32>, vector<32x64xf32>, vector<2x8x64xf32> -> vector<2x8x64xf32>
    "tpu.trace_stop"() : () -> ()
    %226 = vector.shape_cast %139 : vector<1x64xf32> to vector<1x1x64xf32>
    %227 = vector.broadcast %226 : vector<1x1x64xf32> to vector<2x8x64xf32>
    %228 = arith.addf %225, %227 : vector<2x8x64xf32>
    %cst_119 = arith.constant 0.000000e+00 : f32
    %229 = vector.broadcast %cst_119 : f32 to vector<2x8x64xf32>
    %230 = arith.maximumf %228, %229 : vector<2x8x64xf32>
    "tpu.trace_start"() <{level = 10 : i32, message = "bsf,fe->bse"}> : () -> ()
    %cst_120 = arith.constant dense<0.000000e+00> : vector<2x8x32xf32>
    %231 = tpu.matmul %230, %140, %cst_120 {dimension_numbers = #tpu.dot_dimension_numbers<[2], [0], [0, 1], [1], [0, 0, 0, 1, 1, 1], [], []>} : vector<2x8x64xf32>, vector<64x32xf32>, vector<2x8x32xf32> -> vector<2x8x32xf32>
    "tpu.trace_stop"() : () -> ()
    %232 = vector.shape_cast %141 : vector<1x32xf32> to vector<1x1x32xf32>
    %233 = vector.broadcast %232 : vector<1x1x32xf32> to vector<2x8x32xf32>
    %234 = arith.addf %231, %233 : vector<2x8x32xf32>
    %235 = arith.addf %200, %234 : vector<2x8x32xf32>
    %c0_121 = arith.constant 0 : index
    %c0_122 = arith.constant 0 : index
    %c0_123 = arith.constant 0 : index
    %c0_124 = arith.constant 0 : index
    %236 = vector.load %arg37[%c0_121, %c0_122, %c0_123, %c0_124] : memref<2x1x8x32xf32, #tpu.memory_space<vmem>>, vector<1x1x8x32xf32>
    %237 = vector.shape_cast %236 : vector<1x1x8x32xf32> to vector<1x8x32xf32>
    %238 = vector.broadcast %237 : vector<1x8x32xf32> to vector<2x8x32xf32>
    %239 = arith.mulf %235, %238 : vector<2x8x32xf32>
    %cst_125 = arith.constant dense<0.000000e+00> : vector<2x32xf32>
    %240 = vector.multi_reduction <add>, %239, %cst_125 [1] : vector<2x8x32xf32> to vector<2x32xf32>
    %241 = vector.shape_cast %240 : vector<2x32xf32> to vector<2x1x32xf32>
    %cst_126 = arith.constant dense<0.000000e+00> : vector<2x1xf32>
    %242 = vector.multi_reduction <add>, %241, %cst_126 [2] : vector<2x1x32xf32> to vector<2x1xf32>
    %243 = vector.shape_cast %242 : vector<2x1xf32> to vector<2x1x1xf32>
    %c0_127 = arith.constant 0 : index
    %c0_128 = arith.constant 0 : index
    %c0_129 = arith.constant 0 : index
    %244 = vector.load %arg38[%c0_127, %c0_128, %c0_129] : memref<2x1x1xf32, #tpu.memory_space<vmem>>, vector<1x1x1xf32>
    %245 = vector.shape_cast %244 : vector<1x1x1xf32> to vector<1x1xf32>
    %246 = vector.shape_cast %245 : vector<1x1xf32> to vector<1x1x1xf32>
    %247 = vector.broadcast %246 : vector<1x1x1xf32> to vector<2x1x1xf32>
    %248 = arith.addf %243, %247 : vector<2x1x1xf32>
    %c1 = arith.constant 1 : index
    %c0_130 = arith.constant 0 : index
    %c0_131 = arith.constant 0 : index
    %c0_132 = arith.constant 0 : index
    %249 = vector.load %arg37[%c1, %c0_130, %c0_131, %c0_132] : memref<2x1x8x32xf32, #tpu.memory_space<vmem>>, vector<1x1x8x32xf32>
    %250 = vector.shape_cast %249 : vector<1x1x8x32xf32> to vector<1x8x32xf32>
    %251 = vector.broadcast %250 : vector<1x8x32xf32> to vector<2x8x32xf32>
    %252 = arith.mulf %235, %251 : vector<2x8x32xf32>
    %cst_133 = arith.constant dense<0.000000e+00> : vector<2x32xf32>
    %253 = vector.multi_reduction <add>, %252, %cst_133 [1] : vector<2x8x32xf32> to vector<2x32xf32>
    %254 = vector.shape_cast %253 : vector<2x32xf32> to vector<2x1x32xf32>
    %cst_134 = arith.constant dense<0.000000e+00> : vector<2x1xf32>
    %255 = vector.multi_reduction <add>, %254, %cst_134 [2] : vector<2x1x32xf32> to vector<2x1xf32>
    %256 = vector.shape_cast %255 : vector<2x1xf32> to vector<2x1x1xf32>
    %c1_135 = arith.constant 1 : index
    %c0_136 = arith.constant 0 : index
    %c0_137 = arith.constant 0 : index
    %257 = vector.load %arg38[%c1_135, %c0_136, %c0_137] : memref<2x1x1xf32, #tpu.memory_space<vmem>>, vector<1x1x1xf32>
    %258 = vector.shape_cast %257 : vector<1x1x1xf32> to vector<1x1xf32>
    %259 = vector.shape_cast %258 : vector<1x1xf32> to vector<1x1x1xf32>
    %260 = vector.broadcast %259 : vector<1x1x1xf32> to vector<2x1x1xf32>
    %261 = arith.addf %256, %260 : vector<2x1x1xf32>
    %262 = arith.maximumf %248, %261 : vector<2x1x1xf32>
    %263 = arith.subf %248, %262 : vector<2x1x1xf32>
    %264 = math.exp %263 : vector<2x1x1xf32>
    %265 = arith.subf %261, %262 : vector<2x1x1xf32>
    %266 = math.exp %265 : vector<2x1x1xf32>
    %267 = arith.addf %264, %266 : vector<2x1x1xf32>
    %268 = tpu.reciprocal %267 {approx = true} : vector<2x1x1xf32> -> vector<2x1x1xf32>
    %269 = tpu.iota {dimensions = array<i32: 2>} : vector<2x1x2xi32>
    %cst_138 = arith.constant 0.000000e+00 : f32
    %270 = vector.broadcast %cst_138 : f32 to vector<2x1x2xf32>
    %c0_i32_139 = arith.constant 0 : i32
    %271 = vector.broadcast %c0_i32_139 : i32 to vector<2x1x2xi32>
    %272 = arith.cmpi eq, %269, %271 : vector<2x1x2xi32>
    %273 = arith.mulf %264, %268 : vector<2x1x1xf32>
    %cst_140 = arith.constant 0.000000e+00 : f32
    %274 = vector.shape_cast %273 : vector<2x1x1xf32> to vector<2x1x1xf32>
    %275 = vector.broadcast %274 : vector<2x1x1xf32> to vector<2x1x2xf32>
    %276 = vector.broadcast %cst_140 : f32 to vector<2x1x2xf32>
    %277 = arith.select %272, %275, %276 : vector<2x1x2xi1>, vector<2x1x2xf32>
    %278 = arith.addf %270, %277 : vector<2x1x2xf32>
    %c1_i32 = arith.constant 1 : i32
    %279 = vector.broadcast %c1_i32 : i32 to vector<2x1x2xi32>
    %280 = arith.cmpi eq, %269, %279 : vector<2x1x2xi32>
    %281 = arith.mulf %266, %268 : vector<2x1x1xf32>
    %cst_141 = arith.constant 0.000000e+00 : f32
    %282 = vector.shape_cast %281 : vector<2x1x1xf32> to vector<2x1x1xf32>
    %283 = vector.broadcast %282 : vector<2x1x1xf32> to vector<2x1x2xf32>
    %284 = vector.broadcast %cst_141 : f32 to vector<2x1x2xf32>
    %285 = arith.select %280, %283, %284 : vector<2x1x2xi1>, vector<2x1x2xf32>
    %286 = arith.addf %278, %285 : vector<2x1x2xf32>
    %c0_142 = arith.constant 0 : index
    %c0_143 = arith.constant 0 : index
    %c0_144 = arith.constant 0 : index
    %287 = vector.load %arg39[%c0_142, %c0_143, %c0_144] : memref<2x1x2xf32, #tpu.memory_space<vmem>>, vector<2x1x2xf32>
    tpu.vector_store %arg39[%c0_142, %c0_143, %c0_144], %286 {strides = array<i32>} : memref<2x1x2xf32, #tpu.memory_space<vmem>>, vector<2x1x2xf32>,
    return
  }
  func.func @transform_0(%arg0: i32) -> (i32, i32, i32) {
    %c0_i32 = arith.constant 0 : i32
    %c0_i32_0 = arith.constant 0 : i32
    %c0_i32_1 = arith.constant 0 : i32
    %c0_i32_2 = arith.constant 0 : i32
    return %c0_i32, %c0_i32_0, %c0_i32_1 : i32, i32, i32
  }
  func.func @transform_1(%arg0: i32) -> (i32, i32, i32) {
    %c0_i32 = arith.constant 0 : i32
    %c0_i32_0 = arith.constant 0 : i32
    %c0_i32_1 = arith.constant 0 : i32
    %c0_i32_2 = arith.constant 0 : i32
    return %c0_i32, %c0_i32_0, %c0_i32_1 : i32, i32, i32
  }
  func.func @transform_2(%arg0: i32) -> (i32, i32) {
    %c0_i32 = arith.constant 0 : i32
    %c0_i32_0 = arith.constant 0 : i32
    %c0_i32_1 = arith.constant 0 : i32
    return %c0_i32, %c0_i32_0 : i32, i32
  }
  func.func @transform_3(%arg0: i32) -> (i32, i32, i32) {
    %c0_i32 = arith.constant 0 : i32
    %c0_i32_0 = arith.constant 0 : i32
    %c0_i32_1 = arith.constant 0 : i32
    %c0_i32_2 = arith.constant 0 : i32
    return %c0_i32, %c0_i32_0, %c0_i32_1 : i32, i32, i32
  }
  func.func @transform_4(%arg0: i32) -> (i32, i32) {
    %c0_i32 = arith.constant 0 : i32
    %c0_i32_0 = arith.constant 0 : i32
    %c0_i32_1 = arith.constant 0 : i32
    return %c0_i32, %c0_i32_0 : i32, i32
  }
  func.func @transform_5(%arg0: i32) -> (i32, i32) {
    %c0_i32 = arith.constant 0 : i32
    %c0_i32_0 = arith.constant 0 : i32
    %c0_i32_1 = arith.constant 0 : i32
    return %c0_i32, %c0_i32_0 : i32, i32
  }
  func.func @transform_6(%arg0: i32) -> (i32, i32) {
    %c0_i32 = arith.constant 0 : i32
    %c0_i32_0 = arith.constant 0 : i32
    %c0_i32_1 = arith.constant 0 : i32
    return %c0_i32, %c0_i32_0 : i32, i32
  }
  func.func @transform_7(%arg0: i32) -> (i32, i32) {
    %c0_i32 = arith.constant 0 : i32
    %c0_i32_0 = arith.constant 0 : i32
    %c0_i32_1 = arith.constant 0 : i32
    return %c0_i32, %c0_i32_0 : i32, i32
  }
  func.func @transform_8(%arg0: i32) -> (i32, i32) {
    %c0_i32 = arith.constant 0 : i32
    %c0_i32_0 = arith.constant 0 : i32
    %c0_i32_1 = arith.constant 0 : i32
    return %c0_i32, %c0_i32_0 : i32, i32
  }
  func.func @transform_9(%arg0: i32) -> (i32, i32) {
    %c0_i32 = arith.constant 0 : i32
    %c0_i32_0 = arith.constant 0 : i32
    %c0_i32_1 = arith.constant 0 : i32
    return %c0_i32, %c0_i32_0 : i32, i32
  }
  func.func @transform_10(%arg0: i32) -> (i32, i32) {
    %c0_i32 = arith.constant 0 : i32
    %c0_i32_0 = arith.constant 0 : i32
    %c0_i32_1 = arith.constant 0 : i32
    return %c0_i32, %c0_i32_0 : i32, i32
  }
  func.func @transform_11(%arg0: i32) -> (i32, i32) {
    %c0_i32 = arith.constant 0 : i32
    %c0_i32_0 = arith.constant 0 : i32
    %c0_i32_1 = arith.constant 0 : i32
    return %c0_i32, %c0_i32_0 : i32, i32
  }
  func.func @transform_12(%arg0: i32) -> (i32, i32) {
    %c0_i32 = arith.constant 0 : i32
    %c0_i32_0 = arith.constant 0 : i32
    %c0_i32_1 = arith.constant 0 : i32
    return %c0_i32, %c0_i32_0 : i32, i32
  }
  func.func @transform_13(%arg0: i32) -> (i32, i32) {
    %c0_i32 = arith.constant 0 : i32
    %c0_i32_0 = arith.constant 0 : i32
    %c0_i32_1 = arith.constant 0 : i32
    return %c0_i32, %c0_i32_0 : i32, i32
  }
  func.func @transform_14(%arg0: i32) -> (i32, i32) {
    %c0_i32 = arith.constant 0 : i32
    %c0_i32_0 = arith.constant 0 : i32
    %c0_i32_1 = arith.constant 0 : i32
    return %c0_i32, %c0_i32_0 : i32, i32
  }
  func.func @transform_15(%arg0: i32) -> (i32, i32) {
    %c0_i32 = arith.constant 0 : i32
    %c0_i32_0 = arith.constant 0 : i32
    %c0_i32_1 = arith.constant 0 : i32
    return %c0_i32, %c0_i32_0 : i32, i32
  }
  func.func @transform_16(%arg0: i32) -> (i32, i32) {
    %c0_i32 = arith.constant 0 : i32
    %c0_i32_0 = arith.constant 0 : i32
    %c0_i32_1 = arith.constant 0 : i32
    return %c0_i32, %c0_i32_0 : i32, i32
  }
  func.func @transform_17(%arg0: i32) -> (i32, i32) {
    %c0_i32 = arith.constant 0 : i32
    %c0_i32_0 = arith.constant 0 : i32
    %c0_i32_1 = arith.constant 0 : i32
    return %c0_i32, %c0_i32_0 : i32, i32
  }
  func.func @transform_18(%arg0: i32) -> (i32, i32) {
    %c0_i32 = arith.constant 0 : i32
    %c0_i32_0 = arith.constant 0 : i32
    %c0_i32_1 = arith.constant 0 : i32
    return %c0_i32, %c0_i32_0 : i32, i32
  }
  func.func @transform_19(%arg0: i32) -> (i32, i32) {
    %c0_i32 = arith.constant 0 : i32
    %c0_i32_0 = arith.constant 0 : i32
    %c0_i32_1 = arith.constant 0 : i32
    return %c0_i32, %c0_i32_0 : i32, i32
  }
  func.func @transform_20(%arg0: i32) -> (i32, i32) {
    %c0_i32 = arith.constant 0 : i32
    %c0_i32_0 = arith.constant 0 : i32
    %c0_i32_1 = arith.constant 0 : i32
    return %c0_i32, %c0_i32_0 : i32, i32
  }
  func.func @transform_21(%arg0: i32) -> (i32, i32) {
    %c0_i32 = arith.constant 0 : i32
    %c0_i32_0 = arith.constant 0 : i32
    %c0_i32_1 = arith.constant 0 : i32
    return %c0_i32, %c0_i32_0 : i32, i32
  }
  func.func @transform_22(%arg0: i32) -> (i32, i32) {
    %c0_i32 = arith.constant 0 : i32
    %c0_i32_0 = arith.constant 0 : i32
    %c0_i32_1 = arith.constant 0 : i32
    return %c0_i32, %c0_i32_0 : i32, i32
  }
  func.func @transform_23(%arg0: i32) -> (i32, i32) {
    %c0_i32 = arith.constant 0 : i32
    %c0_i32_0 = arith.constant 0 : i32
    %c0_i32_1 = arith.constant 0 : i32
    return %c0_i32, %c0_i32_0 : i32, i32
  }
  func.func @transform_24(%arg0: i32) -> (i32, i32) {
    %c0_i32 = arith.constant 0 : i32
    %c0_i32_0 = arith.constant 0 : i32
    %c0_i32_1 = arith.constant 0 : i32
    return %c0_i32, %c0_i32_0 : i32, i32
  }
  func.func @transform_25(%arg0: i32) -> (i32, i32) {
    %c0_i32 = arith.constant 0 : i32
    %c0_i32_0 = arith.constant 0 : i32
    %c0_i32_1 = arith.constant 0 : i32
    return %c0_i32, %c0_i32_0 : i32, i32
  }
  func.func @transform_26(%arg0: i32) -> (i32, i32) {
    %c0_i32 = arith.constant 0 : i32
    %c0_i32_0 = arith.constant 0 : i32
    %c0_i32_1 = arith.constant 0 : i32
    return %c0_i32, %c0_i32_0 : i32, i32
  }
  func.func @transform_27(%arg0: i32) -> (i32, i32) {
    %c0_i32 = arith.constant 0 : i32
    %c0_i32_0 = arith.constant 0 : i32
    %c0_i32_1 = arith.constant 0 : i32
    return %c0_i32, %c0_i32_0 : i32, i32
  }
  func.func @transform_28(%arg0: i32) -> (i32, i32) {
    %c0_i32 = arith.constant 0 : i32
    %c0_i32_0 = arith.constant 0 : i32
    %c0_i32_1 = arith.constant 0 : i32
    return %c0_i32, %c0_i32_0 : i32, i32
  }
  func.func @transform_29(%arg0: i32) -> (i32, i32) {
    %c0_i32 = arith.constant 0 : i32
    %c0_i32_0 = arith.constant 0 : i32
    %c0_i32_1 = arith.constant 0 : i32
    return %c0_i32, %c0_i32_0 : i32, i32
  }
  func.func @transform_30(%arg0: i32) -> (i32, i32) {
    %c0_i32 = arith.constant 0 : i32
    %c0_i32_0 = arith.constant 0 : i32
    %c0_i32_1 = arith.constant 0 : i32
    return %c0_i32, %c0_i32_0 : i32, i32
  }
  func.func @transform_31(%arg0: i32) -> (i32, i32) {
    %c0_i32 = arith.constant 0 : i32
    %c0_i32_0 = arith.constant 0 : i32
    %c0_i32_1 = arith.constant 0 : i32
    return %c0_i32, %c0_i32_0 : i32, i32
  }
  func.func @transform_32(%arg0: i32) -> (i32, i32) {
    %c0_i32 = arith.constant 0 : i32
    %c0_i32_0 = arith.constant 0 : i32
    %c0_i32_1 = arith.constant 0 : i32
    return %c0_i32, %c0_i32_0 : i32, i32
  }
  func.func @transform_33(%arg0: i32) -> (i32, i32) {
    %c0_i32 = arith.constant 0 : i32
    %c0_i32_0 = arith.constant 0 : i32
    %c0_i32_1 = arith.constant 0 : i32
    return %c0_i32, %c0_i32_0 : i32, i32
  }
  func.func @transform_34(%arg0: i32) -> (i32, i32) {
    %c0_i32 = arith.constant 0 : i32
    %c0_i32_0 = arith.constant 0 : i32
    %c0_i32_1 = arith.constant 0 : i32
    return %c0_i32, %c0_i32_0 : i32, i32
  }
  func.func @transform_35(%arg0: i32) -> (i32, i32) {
    %c0_i32 = arith.constant 0 : i32
    %c0_i32_0 = arith.constant 0 : i32
    %c0_i32_1 = arith.constant 0 : i32
    return %c0_i32, %c0_i32_0 : i32, i32
  }
  func.func @transform_36(%arg0: i32) -> (i32, i32, i32, i32) {
    %c0_i32 = arith.constant 0 : i32
    %c0_i32_0 = arith.constant 0 : i32
    %c0_i32_1 = arith.constant 0 : i32
    %c0_i32_2 = arith.constant 0 : i32
    %c0_i32_3 = arith.constant 0 : i32
    return %c0_i32, %c0_i32_0, %c0_i32_1, %c0_i32_2 : i32, i32, i32, i32
  }
  func.func @transform_37(%arg0: i32) -> (i32, i32, i32) {
    %c0_i32 = arith.constant 0 : i32
    %c0_i32_0 = arith.constant 0 : i32
    %c0_i32_1 = arith.constant 0 : i32
    %c0_i32_2 = arith.constant 0 : i32
    return %c0_i32, %c0_i32_0, %c0_i32_1 : i32, i32, i32
  }
  func.func @transform_38(%arg0: i32) -> (i32, i32, i32) {
    %c0_i32 = arith.constant 0 : i32
    %c0_i32_0 = arith.constant 0 : i32
    %c0_i32_1 = arith.constant 0 : i32
    %c0_i32_2 = arith.constant 0 : i32
    return %c0_i32, %c0_i32_0, %c0_i32_1 : i32, i32, i32
  }
}

</mosaic_0001>

<bundles_post_ra>
// kernel: tpu_custom_call.1
= control target key start
LH: loop header
LB: loop body
LE: loop exit
PB: predicated region body
PF: predicated region fallthrough
CT: control target
= control target key end

     0   :  { %s3479_s6 = smov 1   ;;  %s3480_s10 = smov 2   ;;  %s4056_s0 = inlined_call_operand.smem [shape: u32[39], index: -1, kind: input, shape index: {}] }
   0x1   :  { %s3543_s5 = sld [smem:[%s4056_s0]]   ;;  %s3481_s14 = smov 3  }
   0x2   :  { %s3548_s9 = sld [smem:[%s4056_s0 + %s3479_s6]]   ;;  %s3482_s18 = smov 4  }
   0x3   :  { %s3553_s13 = sld [smem:[%s4056_s0 + %s3480_s10]]   ;;  %s3483_s22 = smov 5  }
   0x4   :  { %s3558_s17 = sld [smem:[%s4056_s0 + %s3481_s14]]   ;;  %s3484_s26 = smov 6  }
   0x5   :  { %s3563_s21 = sld [smem:[%s4056_s0 + %s3482_s18]]   ;;  %s3485_s30 = smov 7  }
   0x6   :  { %s3568_s25 = sld [smem:[%s4056_s0 + %s3483_s22]]   ;;  %s3486_s4 = smov 8  }
   0x7   :  { %s3573_s29 = sld [smem:[%s4056_s0 + %s3484_s26]]   ;;  %s3487_s10 = smov 9  }
   0x8   :  { %s3578_s3 = sld [smem:[%s4056_s0 + %s3485_s30]]   ;;  %s3488_s15 = smov 10  }
   0x9   :  { %s3583_s8 = sld [smem:[%s4056_s0 + %s3486_s4]]   ;;  %s3489_s20 = smov 11  }
   0xa   :  { %s3588_s14 = sld [smem:[%s4056_s0 + %s3487_s10]]   ;;  %s3490_s26 = smov 12  }
   0xb   :  { %4069 = sst [smem:[#allocation31_spill]] %s3563_s21  ;;  %s3491_s1 = smov 13  }
   0xc   :  { %4070 = sst [smem:[#allocation32_spill]] %s3568_s25  ;;  %s3492_s7 = smov 14  }
   0xd   :  { %4071 = sst [smem:[#allocation33_spill]] %s3573_s29  ;;  %s3494_s22 = smov 16  }
   0xe   :  { %4072 = sst [smem:[#allocation34_spill]] %s3578_s3  ;;  %s3495_s28 = smov 17  }
   0xf   :  { %4073 = sst [smem:[#allocation35_spill]] %s3583_s8 }
  0x10   :  { %4074 = sst [smem:[#allocation36_spill]] %s3588_s14 }
  0x11   :  { %s3593_s19 = sld [smem:[%s4056_s0 + %s3488_s15]]   ;;  %s3493_s15 = smov 15  }
  0x12   :  { %s3598_s24 = sld [smem:[%s4056_s0 + %s3489_s20]]  }
  0x13   :  { %s3603_s30 = sld [smem:[%s4056_s0 + %s3490_s26]]  }
  0x14   :  { %s3608_s6 = sld [smem:[%s4056_s0 + %s3491_s1]]  }
  0x15   :  { %s3613_s12 = sld [smem:[%s4056_s0 + %s3492_s7]]   ;;  %s3496_s7 = smov 18  }
  0x16   :  { %s3618_s20 = sld [smem:[%s4056_s0 + %s3493_s15]]   ;;  %s3497_s15 = smov 19  }
  0x17   :  { %4075 = sst [smem:[#allocation37_spill]] %s3593_s19 }
  0x18   :  { %s3623_s27 = sld [smem:[%s4056_s0 + %s3494_s22]]   ;;  %s3498_s22 = smov 20  }
  0x19   :  { %4076 = sst [smem:[#allocation38_spill]] %s3603_s30 }
  0x1a   :  { %s3628_s4 = sld [smem:[%s4056_s0 + %s3495_s28]]   ;;  %s3499_s28 = smov 21  }
  0x1b   :  { %s3633_s30 = sld [smem:[%s4056_s0 + %s3496_s7]]   ;;  %s3500_s7 = smov 22  }
  0x1c   :  { %s3638_s3 = sld [smem:[%s4056_s0 + %s3497_s15]]   ;;  %s3501_s15 = smov 23  }
  0x1d   :  { %s3648_s14 = sld [smem:[%s4056_s0 + %s3499_s28]]   ;;  %s3503_s28 = smov 25  }
  0x1e   :  { %4077 = sst [smem:[#allocation39_spill]] %s3623_s27 }
  0x1f   :  { %s3643_s27 = sld [smem:[%s4056_s0 + %s3498_s22]]   ;;  %s3502_s22 = smov 24  }
  0x20   :  { %s3658_s19 = sld [smem:[%s4056_s0 + %s3501_s15]]   ;;  %s3505_s15 = smov 27  }
  0x21   :  { %4078 = sst [smem:[#allocation40_spill]] %s3633_s30 }
  0x22   :  { %s3653_s30 = sld [smem:[%s4056_s0 + %s3500_s7]]   ;;  %s3504_s7 = smov 26  }
  0x23   :  { %s3663_s25 = sld [smem:[%s4056_s0 + %s3502_s22]]   ;;  %s3506_s22 = smov 28  }
  0x24   :  { %s3668_s21 = sld [smem:[%s4056_s0 + %s3503_s28]]   ;;  %s3507_s28 = smov 29  }
  0x25   :  { %s3678_s8 = sld [smem:[%s4056_s0 + %s3505_s15]]   ;;  %s3509_s15 = smov 31  }
  0x26   :  { %s3688_s29 = sld [smem:[%s4056_s0 + %s3507_s28]]   ;;  %s3511_s28 = smov 33  }
  0x28   :  { %4079 = sst [smem:[#allocation41_spill]] %s3653_s30 }
  0x29   :  { %4080 = sst [smem:[#allocation42_spill]] %s3663_s25 }
  0x2a   :  { %s3673_s30 = sld [smem:[%s4056_s0 + %s3504_s7]]   ;;  %s3508_s7 = smov 30  }
  0x2b   :  { %4082 = sst [smem:[#allocation44_spill]] %s3678_s8 }
  0x2c   :  { %s3683_s25 = sld [smem:[%s4056_s0 + %s3506_s22]]   ;;  %s3510_s22 = smov 32  }
  0x2d   :  { %4084 = sst [smem:[#allocation46_spill]] %s3688_s29 }
  0x2e   :  { %s3698_s8 = sld [smem:[%s4056_s0 + %s3509_s15]]   ;;  %s3513_s15 = smov 35  }
  0x2f   :  { %s3708_s29 = sld [smem:[%s4056_s0 + %s3511_s28]]   ;;  %s3515_s28 = smov 37  }
  0x30   :  { %4081 = sst [smem:[#allocation43_spill]] %s3673_s30 }
  0x31   :  { %s3693_s30 = sld [smem:[%s4056_s0 + %s3508_s7]]   ;;  %s3512_s7 = smov 34  }
  0x32   :  { %4083 = sst [smem:[#allocation45_spill]] %s3683_s25 }
  0x33   :  { %s3703_s25 = sld [smem:[%s4056_s0 + %s3510_s22]]   ;;  %s3514_s22 = smov 36  }
  0x34   :  { %4086 = sst [smem:[#allocation48_spill]] %s3698_s8 }
  0x35   :  { %4088 = sst [smem:[#allocation50_spill]] %s3708_s29 }
  0x36   :  { %s3718_s8 = sld [smem:[%s4056_s0 + %s3513_s15]]  }
  0x37   :  { %4085 = sst [smem:[#allocation47_spill]] %s3693_s30 }
  0x38   :  { %s3713_s30 = sld [smem:[%s4056_s0 + %s3512_s7]]   ;;  %s3516_s7 = smov 38  }
  0x39   :  { %4087 = sst [smem:[#allocation49_spill]] %s3703_s25 }
  0x3a   :  { %s3723_s25 = sld [smem:[%s4056_s0 + %s3514_s22]]  }
  0x3b   :  { %s3728_s29 = sld [smem:[%s4056_s0 + %s3515_s28]]  }
  0x3e   :  { %4089 = sst [smem:[#allocation51_spill]] %s3713_s30 }
  0x3f   :  { %s3733_s30 = sld [smem:[%s4056_s0 + %s3516_s7]]  }
  0x40   :  { %82 = vsyncpa [#allocation3], 0 }
  0x41   :  { %83 = vsyncpa [#allocation6], 0 }
  0x42   :  { %84 = vsyncpa [#allocation9], 0 }
  0x43   :  { %85 = vsyncpa [#allocation12], 0 }
  0x44   :  { %86 = vsyncpa [#allocation15], 0 }
  0x45   :  { %87 = vsyncpa [#allocation18], 0 }
  0x46   :  { %88 = vsyncpa [#allocation21], 0 }
  0x47   :  { %89 = vsyncpa [#allocation4], 0  ;;  %s3517_s15 = smov [#allocation5]   ;;  %s3518_s18 = smov [#allocation8]  }
  0x48   :  { %s112_s16 = sshll.u32 %s3517_s15, 4  ;;  %s148_s22 = sshll.u32 %s3518_s18, 4  ;;  %s113_s16 = int_to_ptr.vmem [resolvable:$true] %s112_s16  ;;  %s149_s22 = int_to_ptr.vmem [resolvable:$true] %s148_s22 }
  0x49   :  { %s3177_s23 = scalar_lea.hbm %s3558_s17, 128 }
  0x4a   :  { %p3178_p0 = scmp.ne.s32.totalorder %s3558_s17, %s3177_s23  ;;  %p3181_p1 = scmp.lt.u32.totalorder %s3177_s23, %s3558_s17 }
  0x4c   :  { %p3183_p2 = pnand %p3181_p1, %p3178_p0 }
  0x4e   :  { %3186 = shalt.err (!%p3183_p2)
}
  0x4f   :  { %s3187_s0 = scalar_lea.vmem %s113_s16, 128  ;;  %p3192_p4 = scmp.lt.s32.totalorder %s113_s16, %s113_s16 }
  0x50   :  { %p3188_p3 = scmp.ne.s32.totalorder %s113_s16, %s3187_s0  ;;  %p3193_p5 = scmp.lt.s32.totalorder %s3187_s0, %s3187_s0 }
  0x52   :  { %p3194_p6 = por %p3193_p5, %p3192_p4 }
  0x54   :  { %p3195_p7 = pnand %p3194_p6, %p3188_p3 }
  0x56   :  { %3198 = shalt.err (!%p3195_p7)
}
  0x57   :  { %115 = dma.hbm_to_vmem [thread:$0]  %s3558_s17, 128, %s113_s16, [#allocation6]  }
  0x58   :  { %s3199_s26 = scalar_lea.hbm %s3608_s6, 16 }
  0x59   :  { %p3200_p8 = scmp.ne.s32.totalorder %s3608_s6, %s3199_s26  ;;  %p3203_p9 = scmp.lt.u32.totalorder %s3199_s26, %s3608_s6 }
  0x5b   :  { %p3205_p10 = pnand %p3203_p9, %p3200_p8 }
  0x5d   :  { %3208 = shalt.err (!%p3205_p10)
}
  0x5e   :  { %s3209_s28 = scalar_lea.vmem %s149_s22, 16  ;;  %s3213_s1 = scalar_lea.vmem %s149_s22, 32 }
  0x5f   :  { %p3210_p11 = scmp.ne.s32.totalorder %s149_s22, %s3209_s28  ;;  %p3214_p12 = scmp.lt.s32.totalorder %s149_s22, %s149_s22 }
  0x60   :  { %p3215_p13 = scmp.lt.s32.totalorder %s3213_s1, %s3209_s28 }
  0x62   :  { %p3216_p0 = por %p3215_p13, %p3214_p12 }
  0x64   :  { %p3217_p1 = pnand %p3216_p0, %p3210_p11 }
  0x66   :  { %3220 = shalt.err (!%p3217_p1)
}
  0x67   :  { %151 = dma.hbm_to_vmem [thread:$0]  %s3608_s6, 16, %s149_s22, [#allocation9]  }
  0x68   :  { %s3519_s2 = smov [#allocation11]   ;;  %s3520_s7 = smov [#allocation14]  }
  0x69   :  { %s168_s17 = sshll.u32 %s3519_s2, 4  ;;  %s192_s10 = sshll.u32 %s3520_s7, 4  ;;  %s169_s17 = int_to_ptr.vmem [resolvable:$true] %s168_s17  ;;  %s193_s10 = int_to_ptr.vmem [resolvable:$true] %s192_s10 }
  0x6a   :  { %s3221_s11 = scalar_lea.hbm %s3618_s20, 16 }
  0x6b   :  { %p3222_p2 = scmp.ne.s32.totalorder %s3618_s20, %s3221_s11  ;;  %p3225_p3 = scmp.lt.u32.totalorder %s3221_s11, %s3618_s20 }
  0x6d   :  { %p3227_p4 = pnand %p3225_p3, %p3222_p2 }
  0x6f   :  { %3230 = shalt.err (!%p3227_p4)
}
  0x70   :  { %s3231_s15 = scalar_lea.vmem %s169_s17, 16  ;;  %s3235_s16 = scalar_lea.vmem %s169_s17, 32 }
  0x71   :  { %p3232_p5 = scmp.ne.s32.totalorder %s169_s17, %s3231_s15  ;;  %p3236_p6 = scmp.lt.s32.totalorder %s169_s17, %s169_s17 }
  0x72   :  { %p3237_p7 = scmp.lt.s32.totalorder %s3235_s16, %s3231_s15 }
  0x74   :  { %p3238_p8 = por %p3237_p7, %p3236_p6 }
  0x76   :  { %p3239_p9 = pnand %p3238_p8, %p3232_p5 }
  0x78   :  { %3242 = shalt.err (!%p3239_p9)
}
  0x79   :  { %171 = dma.hbm_to_vmem [thread:$0]  %s3618_s20, 16, %s169_s17, [#allocation12]  }
  0x7a   :  { %s3243_s6 = scalar_lea.hbm %s3638_s3, 16 }
  0x7b   :  { %p3244_p10 = scmp.ne.s32.totalorder %s3638_s3, %s3243_s6  ;;  %p3247_p11 = scmp.lt.u32.totalorder %s3243_s6, %s3638_s3 }
  0x7d   :  { %p3249_p12 = pnand %p3247_p11, %p3244_p10 }
  0x7f   :  { %3252 = shalt.err (!%p3249_p12)
}
  0x80   :  { %s3253_s18 = scalar_lea.vmem %s193_s10, 16  ;;  %s3257_s22 = scalar_lea.vmem %s193_s10, 32 }
  0x81   :  { %p3254_p13 = scmp.ne.s32.totalorder %s193_s10, %s3253_s18  ;;  %p3258_p0 = scmp.lt.s32.totalorder %s193_s10, %s193_s10 }
  0x82   :  { %p3259_p1 = scmp.lt.s32.totalorder %s3257_s22, %s3253_s18 }
  0x84   :  { %p3260_p2 = por %p3259_p1, %p3258_p0 }
  0x86   :  { %p3261_p3 = pnand %p3260_p2, %p3254_p13 }
  0x88   :  { %3264 = shalt.err (!%p3261_p3)
}
  0x89   :  { %195 = dma.hbm_to_vmem [thread:$0]  %s3638_s3, 16, %s193_s10, [#allocation15]  }
  0x8a   :  { %s3521_s23 = smov [#allocation17]   ;;  %s3522_s0 = smov [#allocation2]  }
  0x8b   :  { %s212_s20 = sshll.u32 %s3521_s23, 4  ;;  %s97_s26 = sshll.u32 %s3522_s0, 4  ;;  %s213_s20 = int_to_ptr.vmem [resolvable:$true] %s212_s20  ;;  %s3751_s26 = int_to_ptr.vmem [resolvable:$true] %s97_s26 }
  0x8c   :  { %s3265_s28 = scalar_lea.hbm %s3648_s14, 16 }
  0x8d   :  { %p3266_p4 = scmp.ne.s32.totalorder %s3648_s14, %s3265_s28  ;;  %p3269_p5 = scmp.lt.u32.totalorder %s3265_s28, %s3648_s14 }
  0x8f   :  { %p3271_p6 = pnand %p3269_p5, %p3266_p4 }
  0x91   :  { %3274 = shalt.err (!%p3271_p6)
}
  0x92   :  { %s3275_s1 = scalar_lea.vmem %s213_s20, 16  ;;  %s3279_s2 = scalar_lea.vmem %s213_s20, 32 }
  0x93   :  { %p3276_p7 = scmp.ne.s32.totalorder %s213_s20, %s3275_s1  ;;  %p3280_p8 = scmp.lt.s32.totalorder %s213_s20, %s213_s20 }
  0x94   :  { %p3281_p9 = scmp.lt.s32.totalorder %s3279_s2, %s3275_s1 }
  0x96   :  { %p3282_p10 = por %p3281_p9, %p3280_p8 }
  0x98   :  { %p3283_p11 = pnand %p3282_p10, %p3276_p7 }
  0x9a   :  { %3286 = shalt.err (!%p3283_p11)
}
  0x9b   :  { %215 = dma.hbm_to_vmem [thread:$0]  %s3648_s14, 16, %s213_s20, [#allocation18]  }
  0x9c   :  { %s3287_s3 = scalar_lea.hbm %s3548_s9, 32 }
  0x9d   :  { %p3288_p12 = scmp.ne.s32.totalorder %s3548_s9, %s3287_s3  ;;  %p3291_p13 = scmp.lt.u32.totalorder %s3287_s3, %s3548_s9 }
  0x9f   :  { %p3293_p0 = pnand %p3291_p13, %p3288_p12 }
  0xa1   :  { %3296 = shalt.err (!%p3293_p0)
}
  0xa2   :  { %s3297_s17 = scalar_lea.vmem %s3751_s26, 32  ;;  %p3302_p2 = scmp.lt.s32.totalorder %s3751_s26, %s3751_s26 }
  0xa3   :  { %p3298_p1 = scmp.ne.s32.totalorder %s3751_s26, %s3297_s17  ;;  %p3303_p3 = scmp.lt.s32.totalorder %s3297_s17, %s3297_s17 }
  0xa5   :  { %p3304_p4 = por %p3303_p3, %p3302_p2 }
  0xa7   :  { %p3305_p5 = pnand %p3304_p4, %p3298_p1 }
  0xa9   :  { %3308 = shalt.err (!%p3305_p5)
}
  0xaa   :  { %s3523_s7 = smov 16   ;;  %s3524_s14 = smov 1  }
  0xab   :  { %103 = dma.hbm_to_vmem [thread:$0]  %s3548_s9, 32, %s3751_s26, [#allocation3], %s3523_s7, %s3523_s7, %s3524_s14  }
  0xac   :  { %s3525_s10 = smov [#allocation7]   ;;  %s3526_s15 = smov [#allocation10]  }
  0xad   :  { %s136_s11 = sshll.u32 %s3525_s10, 4  ;;  %s158_s16 = sshll.u32 %s3526_s15, 4  ;;  %s137_s11 = int_to_ptr.vmem [resolvable:$true] %s136_s11  ;;  %s159_s16 = int_to_ptr.vmem [resolvable:$true] %s158_s16 }
  0xae   :  { %s3309_s6 = scalar_lea.hbm %s3598_s24, 16 }
  0xaf   :  { %p3310_p6 = scmp.ne.s32.totalorder %s3598_s24, %s3309_s6  ;;  %p3313_p7 = scmp.lt.u32.totalorder %s3309_s6, %s3598_s24 }
  0xb1   :  { %p3315_p8 = pnand %p3313_p7, %p3310_p6 }
  0xb3   :  { %3318 = shalt.err (!%p3315_p8)
}
  0xb4   :  { %s3319_s18 = scalar_lea.vmem %s137_s11, 16  ;;  %s3323_s22 = scalar_lea.vmem %s137_s11, 32 }
  0xb5   :  { %p3320_p9 = scmp.ne.s32.totalorder %s137_s11, %s3319_s18  ;;  %p3324_p10 = scmp.lt.s32.totalorder %s137_s11, %s137_s11 }
  0xb6   :  { %p3325_p11 = scmp.lt.s32.totalorder %s3323_s22, %s3319_s18 }
  0xb8   :  { %p3326_p12 = por %p3325_p11, %p3324_p10 }
  0xba   :  { %p3327_p13 = pnand %p3326_p12, %p3320_p9 }
  0xbc   :  { %3330 = shalt.err (!%p3327_p13)
}
  0xbd   :  { %139 = dma.hbm_to_vmem [thread:$0]  %s3598_s24, 16, %s137_s11, [#allocation6]  }
  0xbe   :  { %s3331_s9 = scalar_lea.hbm %s3613_s12, 16 }
  0xbf   :  { %p3332_p0 = scmp.ne.s32.totalorder %s3613_s12, %s3331_s9  ;;  %p3335_p1 = scmp.lt.u32.totalorder %s3331_s9, %s3613_s12 }
  0xc1   :  { %p3337_p2 = pnand %p3335_p1, %p3332_p0 }
  0xc3   :  { %3340 = shalt.err (!%p3337_p2)
}
  0xc4   :  { %s3341_s23 = scalar_lea.vmem %s159_s16, 16  ;;  %s3345_s20 = scalar_lea.vmem %s159_s16, 32 }
  0xc5   :  { %p3342_p3 = scmp.ne.s32.totalorder %s159_s16, %s3341_s23  ;;  %p3346_p4 = scmp.lt.s32.totalorder %s159_s16, %s159_s16 }
  0xc6   :  { %p3347_p5 = scmp.lt.s32.totalorder %s3345_s20, %s3341_s23 }
  0xc8   :  { %p3348_p6 = por %p3347_p5, %p3346_p4 }
  0xca   :  { %p3349_p7 = pnand %p3348_p6, %p3342_p3 }
  0xcc   :  { %3352 = shalt.err (!%p3349_p7)
}
  0xcd   :  { %161 = dma.hbm_to_vmem [thread:$0]  %s3613_s12, 16, %s159_s16, [#allocation9]  }
  0xce   :  { %s3527_s0 = smov [#allocation13]   ;;  %s3528_s26 = smov [#allocation16]  }
  0xcf   :  { %s180_s24 = sshll.u32 %s3527_s0, 4  ;;  %s202_s28 = sshll.u32 %s3528_s26, 4  ;;  %s181_s24 = int_to_ptr.vmem [resolvable:$true] %s180_s24  ;;  %s203_s28 = int_to_ptr.vmem [resolvable:$true] %s202_s28 }
  0xd0   :  { %s3353_s1 = scalar_lea.hbm %s3628_s4, 16 }
  0xd1   :  { %p3354_p8 = scmp.ne.s32.totalorder %s3628_s4, %s3353_s1  ;;  %p3357_p9 = scmp.lt.u32.totalorder %s3353_s1, %s3628_s4 }
  0xd3   :  { %p3359_p10 = pnand %p3357_p9, %p3354_p8 }
  0xd5   :  { %3362 = shalt.err (!%p3359_p10)
}
  0xd6   :  { %s3363_s2 = scalar_lea.vmem %s181_s24, 16  ;;  %s3367_s3 = scalar_lea.vmem %s181_s24, 32 }
  0xd7   :  { %p3364_p11 = scmp.ne.s32.totalorder %s181_s24, %s3363_s2  ;;  %p3368_p12 = scmp.lt.s32.totalorder %s181_s24, %s181_s24 }
  0xd8   :  { %p3369_p13 = scmp.lt.s32.totalorder %s3367_s3, %s3363_s2 }
  0xda   :  { %p3370_p0 = por %p3369_p13, %p3368_p12 }
  0xdc   :  { %p3371_p1 = pnand %p3370_p0, %p3364_p11 }
  0xde   :  { %3374 = shalt.err (!%p3371_p1)
}
  0xdf   :  { %183 = dma.hbm_to_vmem [thread:$0]  %s3628_s4, 16, %s181_s24, [#allocation12]  }
  0xe0   :  { %s3375_s12 = scalar_lea.hbm %s3643_s27, 16 }
  0xe1   :  { %p3376_p2 = scmp.ne.s32.totalorder %s3643_s27, %s3375_s12  ;;  %p3379_p3 = scmp.lt.u32.totalorder %s3375_s12, %s3643_s27 }
  0xe3   :  { %p3381_p4 = pnand %p3379_p3, %p3376_p2 }
  0xe5   :  { %3384 = shalt.err (!%p3381_p4)
}
  0xe6   :  { %s3385_s17 = scalar_lea.vmem %s203_s28, 16  ;;  %s3389_s10 = scalar_lea.vmem %s203_s28, 32 }
  0xe7   :  { %p3386_p5 = scmp.ne.s32.totalorder %s203_s28, %s3385_s17  ;;  %p3390_p6 = scmp.lt.s32.totalorder %s203_s28, %s203_s28 }
  0xe8   :  { %p3391_p7 = scmp.lt.s32.totalorder %s3389_s10, %s3385_s17 }
  0xea   :  { %p3392_p8 = por %p3391_p7, %p3390_p6 }
  0xec   :  { %p3393_p9 = pnand %p3392_p8, %p3386_p5 }
  0xee   :  { %3396 = shalt.err (!%p3393_p9)
}
  0xef   :  { %205 = dma.hbm_to_vmem [thread:$0]  %s3643_s27, 16, %s203_s28, [#allocation15]  }
  0xf0   :  { %s3529_s11 = smov [#allocation19]   ;;  %s3530_s15 = smov [#allocation20]  }
  0xf1   :  { %s224_s4 = sshll.u32 %s3529_s11, 4  ;;  %s236_s16 = sshll.u32 %s3530_s15, 4  ;;  %s225_s4 = int_to_ptr.vmem [resolvable:$true] %s224_s4  ;;  %s237_s16 = int_to_ptr.vmem [resolvable:$true] %s236_s16 }
  0xf2   :  { %s3397_s6 = scalar_lea.hbm %s3658_s19, 16 }
  0xf3   :  { %p3398_p10 = scmp.ne.s32.totalorder %s3658_s19, %s3397_s6  ;;  %p3401_p11 = scmp.lt.u32.totalorder %s3397_s6, %s3658_s19 }
  0xf5   :  { %p3403_p12 = pnand %p3401_p11, %p3398_p10 }
  0xf7   :  { %3406 = shalt.err (!%p3403_p12)
}
  0xf8   :  { %s3407_s18 = scalar_lea.vmem %s225_s4, 16  ;;  %s3411_s22 = scalar_lea.vmem %s225_s4, 32 }
  0xf9   :  { %p3408_p13 = scmp.ne.s32.totalorder %s225_s4, %s3407_s18  ;;  %p3412_p0 = scmp.lt.s32.totalorder %s225_s4, %s225_s4 }
  0xfa   :  { %p3413_p1 = scmp.lt.s32.totalorder %s3411_s22, %s3407_s18 }
  0xfc   :  { %p3414_p2 = por %p3413_p1, %p3412_p0 }
  0xfe   :  { %p3415_p3 = pnand %p3414_p2, %p3408_p13 }
 0x100   :  { %3418 = shalt.err (!%p3415_p3)
}
 0x101   :  { %227 = dma.hbm_to_vmem [thread:$0]  %s3658_s19, 16, %s225_s4, [#allocation18]  }
 0x102   :  { %s3419_s27 = scalar_lea.hbm %s3668_s21, 16 }
 0x103   :  { %p3420_p4 = scmp.ne.s32.totalorder %s3668_s21, %s3419_s27  ;;  %p3423_p5 = scmp.lt.u32.totalorder %s3419_s27, %s3668_s21 }
 0x105   :  { %p3425_p6 = pnand %p3423_p5, %p3420_p4 }
 0x107   :  { %3428 = shalt.err (!%p3425_p6)
}
 0x108   :  { %s3429_s9 = scalar_lea.vmem %s237_s16, 16  ;;  %s3433_s23 = scalar_lea.vmem %s237_s16, 32 }
 0x109   :  { %p3430_p7 = scmp.ne.s32.totalorder %s237_s16, %s3429_s9  ;;  %p3434_p8 = scmp.lt.s32.totalorder %s237_s16, %s237_s16 }
 0x10a   :  { %p3435_p9 = scmp.lt.s32.totalorder %s3433_s23, %s3429_s9 }
 0x10c   :  { %p3436_p10 = por %p3435_p9, %p3434_p8 }
 0x10e   :  { %p3437_p11 = pnand %p3436_p10, %p3430_p7 }
 0x110   :  { %3440 = shalt.err (!%p3437_p11)
}
 0x111   :  { %239 = dma.hbm_to_vmem [thread:$0]  %s3668_s21, 16, %s237_s16, [#allocation21]  }
 0x112   :  { %3463 = dma.done.wait [#allocation3], 32  }
 0x113   :  { %3464 = vsyncadd [#allocation3], 4294967264 }
 0x114   :  { %3465 = dma.done.wait [#allocation6], 144  }
 0x115   :  { %3466 = vsyncadd [#allocation6], 4294967152 }
 0x116   :  { %3467 = dma.done.wait [#allocation9], 32  }
 0x117   :  { %3468 = vsyncadd [#allocation9], 4294967264 }
 0x118   :  { %3469 = dma.done.wait [#allocation12], 32  }
 0x119   :  { %3470 = vsyncadd [#allocation12], 4294967264 }
 0x11a   :  { %3471 = dma.done.wait [#allocation15], 32  }
 0x11b   :  { %3472 = vsyncadd [#allocation15], 4294967264 }
 0x11c   :  { %3473 = dma.done.wait [#allocation18], 32  }
 0x11d   :  { %3474 = vsyncadd [#allocation18], 4294967264 }
 0x11e   :  { %3475 = dma.done.wait [#allocation21], 16  }
 0x11f   :  { %3476 = vsyncadd [#allocation21], 4294967280  ;;  %v3531_v0 = vmov 0   ;;  %v300_v1 = vld [vmem:[%s3543_s5] sm:$0xff]  ;;  %v317_v3 = vld [vmem:[%s3553_s13 + $0x8] sm:$0xff]  ;;  %v3532_v15 = vmov 0.0   ;;  %v302_v16 = vlaneseq }
 0x120   :  { %3131 = vset.pattern.permute.xlu0 %v3531_v0  ;;  %3132 = vset.pattern.permute.xlu1 %v3531_v0  ;;  %v316_v2 = vld [vmem:[%s3553_s13] sm:$0xff]  ;;  %v318_v4 = vld [vmem:[%s3553_s13 + $0x10] sm:$0xff]  ;;  %v319_v5 = vld [vmem:[%s3553_s13 + $0x18] sm:$0xff]  ;;  %vm324_vm0 = vcmask 523264   ;;  %vm453_vm3 = vcmask 261120   ;;  %s4092_s21 = sld [smem:[#allocation31_spill]] }
 0x121   :  { %305 = vperm.xlu0 %3131, %v300_v1   ;;  %v301_v6 = vld [vmem:[%s3543_s5 + $0x8] sm:$0xff]  ;;  %v2947_v7 = vpack.c.bf16 %v317_v3, %v316_v2  ;;  %v2951_v8 = vpack.c.bf16 %v319_v5, %v318_v4  ;;  %v320_v9 = vld [vmem:[%s3553_s13 + $0x20] sm:$0xff]  ;;  %v322_v12 = vld [vmem:[%s3553_s13 + $0x30] sm:$0xff]  ;;  %v3807_v17 = vand.u32 127, %v302_v16  ;;  %s4090_s5 = sld [smem:[#allocation33_spill]]  ;;  %s4093_s19 = sld [smem:[#allocation32_spill]] }
 0x122   :  { %v321_v10 = vld [vmem:[%s3553_s13 + $0x28] sm:$0xff]  ;;  %v323_v13 = vld [vmem:[%s3553_s13 + $0x38] sm:$0xff]  ;;  %s4091_s13 = sld [smem:[#allocation35_spill]]  ;;  %s4094_s20 = sld [smem:[#allocation37_spill]]  ;;  %vm3533_vm4 = vmmov 0   ;;  %vm914_vm8 = vcmask 64512  }
 0x123   :  { %2948 = vmatprep.subr.bf16.mxu0 %v2947_v7  ;;  %v2955_v11 = vpack.c.bf16 %v321_v10, %v320_v9  ;;  %v2959_v14 = vpack.c.bf16 %v323_v13, %v322_v12  ;;  %v408_v23 = vld [vmem:[#allocation5] sm:$0xff]  ;;  %s4095_s0 = sld [smem:[#allocation36_spill]]  ;;  %s4096_s24 = sld [smem:[#allocation34_spill]]  ;;  %vm2458_vm10 = vcmp.eq.s32.totalorder %v3807_v17, 0  ;;  %vm2483_vm11 = vcmp.eq.s32.totalorder %v3807_v17, 1 }
 0x124   :  { %2950 = vmatpush3.bf16.msra.mxu0 %v2947_v7  ;;  %s4097_s26 = sld [smem:[#allocation38_spill]]  ;;  %s4102_s28 = sld [smem:[#allocation39_spill]]  ;;  %vm2508_vm12 = vcmask 8192  }
 0x125   :  { %308 = vperm.xlu0 %3131, %v301_v6   ;;  %2952 = vmatprep.subr.bf16.mxu0 %v2951_v8  ;;  %s4103_s1 = sld [smem:[#allocation40_spill]]  ;;  %s4104_s2 = sld [smem:[#allocation41_spill]] }
 0x126   :  { %v2576_v57 = vld [vmem:[%s4092_s21] ss:$0 sm:$0xff]  ;;  %s4105_s3 = sld [smem:[#allocation43_spill]]  ;;  %s4106_s12 = sld [smem:[#allocation42_spill]] }
 0x127   :  { %v417_v41 = vld [vmem:[%s4090_s5] sm:$0xff]  ;;  %v418_v42 = vld [vmem:[%s4090_s5 + $0x8] sm:$0xff]  ;;  %v419_v43 = vld [vmem:[%s4090_s5 + $0x10] sm:$0xff]  ;;  %s4107_s17 = sld [smem:[#allocation44_spill]]  ;;  %s4108_s10 = sld [smem:[#allocation45_spill]] }
 0x128   :  { %2954 = vmatpush3.bf16.msra.mxu0 %v2951_v8  ;;  %v2963_v44 = vpack.c.bf16 %v418_v42, %v417_v41  ;;  %v420_v45 = vld [vmem:[%s4090_s5 + $0x18] sm:$0xff]  ;;  %v422_v47 = vld [vmem:[%s4091_s13] sm:$0xff]  ;;  %v423_v48 = vld [vmem:[%s4091_s13 + $0x8] sm:$0xff]  ;;  %s4109_s11 = sld [smem:[#allocation46_spill]]  ;;  %s4110_s4 = sld [smem:[#allocation49_spill]] }
 0x129   :  { %2956 = vmatprep.subr.bf16.mxu0 %v2955_v11  ;;  %v2967_v46 = vpack.c.bf16 %v420_v45, %v419_v43  ;;  %v2971_v49 = vpack.c.bf16 %v423_v48, %v422_v47  ;;  %v2577_v59 = vld [vmem:[%s4093_s19] ss:$0 sm:$0xff]  ;;  %v424_v1 = vld [vmem:[%s4091_s13 + $0x10] sm:$0xff]  ;;  %v425_v2 = vld [vmem:[%s4091_s13 + $0x18] sm:$0xff]  ;;  %s4111_s15 = sld [smem:[#allocation51_spill]]  ;;  %s4112_s16 = sld [smem:[#allocation47_spill]] }
 0x12a   :  { %2964 = vmatprep.subr.bf16.mxu1 %v2963_v44  ;;  %v2975_v5 = vpack.c.bf16 %v425_v2, %v424_v1  ;;  %v427_v6 = vld [vmem:[%s4094_s20] sm:$0xff]  ;;  %v428_v7 = vld [vmem:[%s4094_s20 + $0x8] sm:$0xff]  ;;  %v429_v9 = vld [vmem:[%s4094_s20 + $0x10] sm:$0xff]  ;;  %s4113_s6 = sld [smem:[#allocation48_spill]]  ;;  %s4114_s18 = sld [smem:[#allocation50_spill]] }
 0x12b   :  { %2966 = vmatpush3.bf16.msra.mxu1 %v2963_v44  ;;  %v2979_v8 = vpack.c.bf16 %v428_v7, %v427_v6  ;;  %v430_v10 = vld [vmem:[%s4094_s20 + $0x18] sm:$0xff] }
 0x12c   :  { %2958 = vmatpush3.bf16.msra.mxu0 %v2955_v11  ;;  %2968 = vmatprep.subr.bf16.mxu1 %v2967_v46  ;;  %v2983_v11 = vpack.c.bf16 %v430_v10, %v429_v9 }
 0x12d   :  { %2960 = vmatprep.subr.bf16.mxu0 %v2959_v14 }
 0x12f   :  { %2970 = vmatpush3.bf16.msra.mxu1 %v2967_v46 }
 0x130   :  { %2962 = vmatpush3.bf16.msra.mxu0 %v2959_v14  ;;  %2972 = vmatprep.subr.bf16.mxu1 %v2971_v49  ;;  %v2581_v14 = vld [vmem:[%s4095_s0] ss:$0 sm:$0xff] }
 0x131   :  { %2802 = vmatprep.subr.mxu0 %v3532_v15 }
 0x1a0   :  { %v306_v18 = vpop.permute.xlu0 %305 }
 0x1a1   :  { %vm310_vm1 = vcmp.eq.s32.totalorder %v3807_v17, %v306_v18 }
 0x1a2   :  { %v2572_v19 = vsel %vm310_vm1, 1.0, %v3532_v15 }
 0x1a3   :  { %2756 = vmatprep.mubr.msk.f32.mxu0 %vm324_vm0, %v2572_v19 }
 0x1a4   :  { %v309_v20 = vpop.permute.xlu0 %308 }
 0x1a5   :  { %vm311_vm2 = vcmp.eq.s32.totalorder %v3807_v17, %v309_v20  ;;  %v2578_v20 = vld [vmem:[%s4096_s24] ss:$0 sm:$0xff] }
 0x1a6   :  { %v2573_v21 = vsel %vm311_vm2, 1.0, %v3532_v15 }
 0x1a7   :  { %2757 = vmatmul.mubr.msk.f32.vlgmr.msra.gmra.mrb[0].mxu0 %vm324_vm0, %v2573_v21 }
 0x1a8   :  { %2804 = vmatprep.mubr.msk.f32.mxu0 %vm3533_vm4, %v3532_v15 }
 0x27a   :  { %v2758_v22 = vpop.f32.mrb[0].mxu0 }
 0x27b   :  { %v397_v24 = vpop.f32.mrb[1].mxu0  ;;  %v407_v25 = vmul.f32 5.656854, %v2758_v22 }
 0x27c   :  { %v406_v26 = vmul.f32 5.656854, %v397_v24  ;;  %v2584_v24 = vld [vmem:[#allocation7] ss:$0 sm:$0xff] }
 0x27d   :  { %v3817_v28 = vadd.f32 %v408_v23, %v407_v25 }
 0x27e   :  { %v3815_v27 = vadd.f32 %v408_v23, %v406_v26 }
 0x27f   :  { %v457_v30 = vsel %vm453_vm3, %v3817_v28, 0.0 }
 0x280   :  { %v454_v29 = vsel %vm453_vm3, %v3815_v27, 0.0 }
 0x281   :  { %455 = vadd.xlane.f32.xlu1 %v454_v29 }
 0x285   :  { %458 = vadd.xlane.f32.xlu1 %v457_v30 }
 0x30e   :  { %v456_v31 = vpop.xlane.xlu1 %455 }
 0x30f   :  { %v461_v32 = vmul.f32 0.03125, %v456_v31 }
 0x311   :  { %v463_v33 = vsub.f32 %v3815_v27, %v461_v32  ;;  %v432_v32 = vld [vmem:[%s4097_s26] sm:$0xff] }
 0x312   :  { %v459_v34 = vpop.xlane.xlu1 %458 }
 0x313   :  { %v462_v35 = vmul.f32 0.03125, %v459_v34  ;;  %v465_v36 = vmul.f32 %v463_v33, %v463_v33 }
 0x315   :  { %v464_v37 = vsub.f32 %v3817_v28, %v462_v35  ;;  %v467_v38 = vsel %vm453_vm3, %v465_v36, 0.0  ;;  %v411_v35 = vld [vmem:[#allocation2] sm:$0x1]  ;;  %v903_v36 = vshrl.u32 %v302_v16, 7 }
 0x316   :  { %468 = vadd.xlane.f32.xlu0 %v467_v38  ;;  %vm413_vm5 = vcmp.eq.s32.totalorder %v411_v35, 0 }
 0x317   :  { %v466_v39 = vmul.f32 %v464_v37, %v464_v37  ;;  %v3870_v38 = vsub.s32 0, %v903_v36 }
 0x319   :  { %v470_v40 = vsel %vm453_vm3, %v466_v39, 0.0  ;;  %v900_v39 = vsel %vm413_vm5, 1, %v3531_v0 }
 0x31a   :  { %471 = vadd.xlane.f32.xlu1 %v470_v40  ;;  %v905_v40 = vrot.slane %v900_v39, %v3870_v38 }
 0x31c   :  { %vm3875_vm7 = vcmp.eq.s32.totalorder %v905_v40, 1  ;;  %v2593_v40 = vld [vmem:[#allocation8] ss:$0 sm:$0xff] }
 0x3a3   :  { %v469_v50 = vpop.xlane.xlu0 %468 }
 0x3a4   :  { %v473_v51 = vmul.f32 0.03125, %v469_v50 }
 0x3a6   :  { %v475_v52 = vadd.f32 1e-05, %v473_v51 }
 0x3a7   :  { %v472_v53 = vpop.xlane.xlu1 %471 }
 0x3a8   :  { %3133 = vrsqrt.f32 %v475_v52  ;;  %v474_v54 = vmul.f32 0.03125, %v472_v53 }
 0x3aa   :  { %v476_v55 = vadd.f32 1e-05, %v474_v54 }
 0x3ac   :  { %3135 = vrsqrt.f32 %v476_v55 }
 0x3b2   :  { %v3134_v56 = vpop.eup %3133 }
 0x3b3   :  { %v479_v58 = vmul.f32 %v3134_v56, %v463_v33  ;;  %v433_v33 = vld [vmem:[%s4097_s26 + $0x8] sm:$0xff] }
 0x3b4   :  { %v3866_v34 = vpack.c.bf16 %v433_v33, %v432_v32  ;;  %v435_v32 = vld [vmem:[%s4097_s26 + $0x18] sm:$0xff] }
 0x3b5   :  { %v487_v60 = vmul.f32 %v2576_v57, %v479_v58 }
 0x3b6   :  { %v3136_v61 = vpop.eup %3135 }
 0x3b7   :  { %v480_v62 = vmul.f32 %v3136_v61, %v464_v37  ;;  %v495_v63 = vadd.f32 %v2577_v59, %v487_v60  ;;  %v412_v37 = vld [vmem:[#allocation2 + $0x1] sm:$0x1] }
 0x3b8   :  { %vm414_vm6 = vcmp.eq.s32.totalorder %v412_v37, 0 }
 0x3b9   :  { %v488_v3 = vmul.f32 %v2576_v57, %v480_v62  ;;  %2767 = vmatprep.mubr.msk.f32.mxu1 %vm453_vm3, %v495_v63  ;;  %v901_v41 = vsel %vm414_vm6, 1, %v3531_v0 }
 0x3ba   :  { %v909_v44 = vrot.slane %v901_v41, %v3870_v38 }
 0x3bb   :  { %v496_v4 = vadd.f32 %v2577_v59, %v488_v3 }
 0x3bc   :  { %vm3883_vm9 = vcmp.eq.s32.totalorder %v909_v44, 1 }
 0x3bd   :  { %2768 = vmatmul.mubr.msk.f32.vlgmr.msra.gmra.mrb[0].mxu1 %vm453_vm3, %v496_v4 }
 0x3be   :  { %2974 = vmatpush3.bf16.msra.mxu1 %v2971_v49  ;;  %2778 = vmatprep.mubr.msk.f32.mxu1 %vm453_vm3, %v495_v63 }
 0x3bf   :  { %2976 = vmatprep.subr.bf16.mxu1 %v2975_v5 }
 0x3c2   :  { %2978 = vmatpush3.bf16.msra.mxu1 %v2975_v5 }
 0x3c3   :  { %2980 = vmatprep.subr.bf16.mxu1 %v2979_v8 }
 0x3c5   :  { %2779 = vmatmul.mubr.msk.f32.vlgmr.msra.gmra.mrb[2].mxu1 %vm453_vm3, %v496_v4 }
 0x3c6   :  { %2982 = vmatpush3.bf16.msra.mxu1 %v2979_v8  ;;  %2789 = vmatprep.mubr.msk.f32.mxu1 %vm453_vm3, %v495_v63 }
 0x3c7   :  { %2984 = vmatprep.subr.bf16.mxu1 %v2983_v11 }
 0x3ca   :  { %2986 = vmatpush3.bf16.msra.mxu1 %v2983_v11 }
 0x3cb   :  { %2792 = vmatprep.subr.mxu1 %v3532_v15 }
 0x3cd   :  { %2790 = vmatmul.mubr.msk.f32.vlgmr.msra.gmra.mrb[4].mxu1 %vm453_vm3, %v496_v4 }
 0x3ce   :  { %2794 = vmatprep.mubr.msk.f32.mxu1 %vm3533_vm4, %v3532_v15 }
 0x490   :  { %v2769_v12 = vpop.f32.mrb[0].mxu1 }
 0x491   :  { %v575_v13 = vpop.f32.mrb[1].mxu1  ;;  %v581_v26 = vadd.f32 %v2769_v12, %v2578_v20 }
 0x492   :  { %v576_v22 = vadd.f32 %v2578_v20, %v575_v13 }
 0x498   :  { %v2780_v18 = vpop.f32.mrb[2].mxu1 }
 0x499   :  { %v656_v19 = vpop.f32.mrb[3].mxu1  ;;  %v662_v23 = vadd.f32 %v2780_v18, %v2581_v14 }
 0x49a   :  { %v657_v21 = vadd.f32 %v2581_v14, %v656_v19 }
 0x49c   :  { %2793 = vmatpush3.xpose.msk.msra.mxu1 %vm453_vm3, %v657_v21 }
 0x49d   :  { %2797 = vmatprep.subr.mxu1 %v3532_v15 }
 0x49f   :  { %2795 = vmatmul.mubr.msk.f32.vlgmr.msra.gmra.mrb[6].mxu1 %vm453_vm3, %v576_v22 }
 0x4a0   :  { %v2791_v25 = vpop.f32.mrb[4].mxu1  ;;  %2798 = vmatpush3.xpose.msk.msra.mxu1 %vm453_vm3, %v662_v23  ;;  %2799 = vmatprep.mubr.msk.f32.mxu1 %vm3533_vm4, %v3532_v15 }
 0x4a1   :  { %v743_v29 = vadd.f32 %v2791_v25, %v2584_v24  ;;  %v737_v30 = vpop.f32.mrb[5].mxu1  ;;  %2807 = vmatprep.subr.mxu1 %v3532_v15 }
 0x4a2   :  { %v738_v31 = vadd.f32 %v2584_v24, %v737_v30 }
 0x4a3   :  { %2800 = vmatmul.mubr.msk.f32.vlgmr.msra.gmra.mrb[8].mxu1 %vm453_vm3, %v581_v26 }
 0x4a4   :  { %2803 = vmatpush3.msra.mxu0 %v738_v31  ;;  %2808 = vmatpush3.msra.mxu1 %v743_v29  ;;  %v434_v31 = vld [vmem:[%s4097_s26 + $0x10] sm:$0xff] }
 0x4a5   :  { %2809 = vmatprep.mubr.msk.f32.mxu1 %vm3533_vm4, %v3532_v15  ;;  %2988 = vmatprep.subr.bf16.mxu0 %v3866_v34  ;;  %v2991_v33 = vpack.c.bf16 %v435_v32, %v434_v31  ;;  %v2598_v32 = vld [vmem:[#allocation13] ss:$0 sm:$0xff] }
 0x572   :  { %v818_v42 = vpop.f32.mrb[6].mxu1 }
 0x573   :  { %v898_v45 = vmul.f32 0.17677669, %v818_v42  ;;  %v2796_v16 = vpop.f32.mrb[7].mxu1 }
 0x575   :  { %v912_v46 = vsel %vm3875_vm7, -1e+09, %v898_v45 }
 0x576   :  { %v915_v47 = vsel %vm914_vm8, %v912_v46, -inf  ;;  %v894_v48 = vpop.f32.mrb[8].mxu1 }
 0x577   :  { %v916_v0 = vrot.slane %v915_v47, 4  ;;  %v899_v50 = vmul.f32 0.17677669, %v894_v48  ;;  %v2801_v51 = vpop.f32.mrb[9].mxu1 }
 0x579   :  { %v917_v52 = vmax.f32 %v915_v47, %v916_v0  ;;  %v913_v53 = vsel %vm3883_vm9, -1e+09, %v899_v50 }
 0x57a   :  { %v922_v54 = vsel %vm914_vm8, %v913_v53, -inf }
 0x57b   :  { %v918_v55 = vrot.slane %v917_v52, 2  ;;  %v923_v56 = vrot.slane %v922_v54, 4 }
 0x57d   :  { %v919_v57 = vmax.f32 %v917_v52, %v918_v55  ;;  %v924_v58 = vmax.f32 %v922_v54, %v923_v56  ;;  %v439_v56 = vld [vmem:[%s4102_s28] sm:$0xff] }
 0x57f   :  { %v920_v59 = vrot.slane %v919_v57, 1  ;;  %v925_v60 = vrot.slane %v924_v58, 2 }
 0x581   :  { %v921_v61 = vmax.f32 %v919_v57, %v920_v59  ;;  %v926_v62 = vmax.f32 %v924_v58, %v925_v60  ;;  %v440_v57 = vld [vmem:[%s4102_s28 + $0x8] sm:$0xff]  ;;  %v441_v59 = vld [vmem:[%s4102_s28 + $0x10] sm:$0xff]  ;;  %v442_v60 = vld [vmem:[%s4102_s28 + $0x18] sm:$0xff] }
 0x582   :  { %v2995_v58 = vpack.c.bf16 %v440_v57, %v439_v56  ;;  %v1410_v57 = vld [vmem:[%s4104_s2] sm:$0xff] }
 0x583   :  { %v929_v63 = vsub.f32 %v912_v46, %v921_v61  ;;  %v927_v1 = vrot.slane %v926_v62, 1  ;;  %v2999_v61 = vpack.c.bf16 %v442_v60, %v441_v59  ;;  %v1420_v60 = vld [vmem:[%s4105_s3] sm:$0xff] }
 0x584   :  { %2996 = vmatprep.subr.bf16.mxu1 %v2995_v58 }
 0x585   :  { %v931_v2 = vmul.f32 1.442695, %v929_v63  ;;  %v928_v3 = vmax.f32 %v926_v62, %v927_v1  ;;  %v444_v62 = vld [vmem:[%s4103_s1] sm:$0xff]  ;;  %v445_v63 = vld [vmem:[%s4103_s1 + $0x8] sm:$0xff]  ;;  %v446_v1 = vld [vmem:[%s4103_s1 + $0x10] sm:$0xff] }
 0x587   :  { %3137 = vpow2.f32 %v931_v2  ;;  %v930_v4 = vsub.f32 %v913_v53, %v928_v3  ;;  %v3003_v2 = vpack.c.bf16 %v445_v63, %v444_v62  ;;  %v447_v3 = vld [vmem:[%s4103_s1 + $0x18] sm:$0xff]  ;;  %v1412_v63 = vld [vmem:[%s4104_s2 + $0x10] sm:$0xff] }
 0x589   :  { %v933_v5 = vmul.f32 1.442695, %v930_v4  ;;  %v3007_v4 = vpack.c.bf16 %v447_v3, %v446_v1  ;;  %v1413_v1 = vld [vmem:[%s4104_s2 + $0x18] sm:$0xff]  ;;  %v1422_v3 = vld [vmem:[%s4105_s3 + $0x10] sm:$0xff] }
 0x58b   :  { %3139 = vpow2.f32 %v933_v5  ;;  %v448_v5 = vld [vmem:[%s4103_s1 + $0x20] sm:$0xff] }
 0x591   :  { %v3138_v6 = vpop.eup %3137 }
 0x592   :  { %v935_v7 = vsel %vm914_vm8, %v3138_v6, 0.0 }
 0x593   :  { %v936_v8 = vrot.slane %v935_v7, 4 }
 0x595   :  { %v3140_v9 = vpop.eup %3139  ;;  %v937_v10 = vadd.f32 %v936_v8, %v935_v7 }
 0x596   :  { %v942_v11 = vsel %vm914_vm8, %v3140_v9, 0.0 }
 0x597   :  { %v938_v12 = vrot.slane %v937_v10, 2  ;;  %v943_v13 = vrot.slane %v942_v11, 4 }
 0x599   :  { %v939_v14 = vadd.f32 %v938_v12, %v937_v10  ;;  %v944_v18 = vadd.f32 %v943_v13, %v942_v11 }
 0x59b   :  { %v940_v19 = vrot.slane %v939_v14, 1  ;;  %v945_v20 = vrot.slane %v944_v18, 2 }
 0x59d   :  { %v941_v21 = vadd.f32 %v940_v19, %v939_v14  ;;  %v946_v22 = vadd.f32 %v945_v20, %v944_v18  ;;  %v2596_v18 = vld [vmem:[#allocation10] ss:$0 sm:$0xff]  ;;  %v2597_v20 = vld [vmem:[#allocation11] ss:$0 sm:$0xff] }
 0x59f   :  { %3141 = vrcp.f32 %v941_v21  ;;  %v947_v23 = vrot.slane %v946_v22, 1 }
 0x5a1   :  { %v948_v24 = vadd.f32 %v947_v23, %v946_v22 }
 0x5a3   :  { %3143 = vrcp.f32 %v948_v24 }
 0x5a9   :  { %v3142_v25 = vpop.eup %3141 }
 0x5aa   :  { %v951_v26 = vmul.f32 %v3142_v25, %v3138_v6  ;;  %v449_v6 = vld [vmem:[%s4103_s1 + $0x28] sm:$0xff] }
 0x5ab   :  { %v3011_v7 = vpack.c.bf16 %v449_v6, %v448_v5  ;;  %v1415_v6 = vld [vmem:[%s4106_s12] sm:$0xff] }
 0x5ac   :  { %2805 = vmatmul.mubr.msk.f32.vlgmr.msra.gmra.mrb[2].mxu0 %vm914_vm8, %v951_v26 }
 0x5ad   :  { %v3144_v29 = vpop.eup %3143  ;;  %2990 = vmatpush3.bf16.msra.mxu0 %v3866_v34 }
 0x5ae   :  { %v952_v30 = vmul.f32 %v3144_v29, %v3140_v9  ;;  %2992 = vmatprep.subr.bf16.mxu0 %v2991_v33  ;;  %v450_v29 = vld [vmem:[%s4103_s1 + $0x30] sm:$0xff] }
 0x5b0   :  { %2810 = vmatmul.mubr.msk.f32.vlgmr.msra.gmra.mrb[10].mxu1 %vm914_vm8, %v952_v30  ;;  %v451_v30 = vld [vmem:[%s4103_s1 + $0x38] sm:$0xff] }
 0x5b1   :  { %2994 = vmatpush3.bf16.msra.mxu0 %v2991_v33  ;;  %2998 = vmatpush3.bf16.msra.mxu1 %v2995_v58  ;;  %v3015_v31 = vpack.c.bf16 %v451_v30, %v450_v29  ;;  %v1411_v58 = vld [vmem:[%s4104_s2 + $0x8] sm:$0xff]  ;;  %v1418_v29 = vld [vmem:[%s4106_s12 + $0x18] sm:$0xff] }
 0x5b2   :  { %3000 = vmatprep.subr.bf16.mxu1 %v2999_v61  ;;  %3004 = vmatprep.subr.bf16.mxu0 %v3003_v2  ;;  %v3019_v59 = vpack.c.bf16 %v1411_v58, %v1410_v57 }
 0x5b5   :  { %3002 = vmatpush3.bf16.msra.mxu1 %v2999_v61  ;;  %v1421_v61 = vld [vmem:[%s4105_s3 + $0x8] sm:$0xff] }
 0x5b6   :  { %v3035_v62 = vpack.c.bf16 %v1421_v61, %v1420_v60  ;;  %3020 = vmatprep.subr.bf16.mxu1 %v3019_v59 }
 0x67f   :  { %v1022_v35 = vpop.f32.mrb[2].mxu0 }
 0x680   :  { %v2806_v36 = vpop.f32.mrb[3].mxu0  ;;  %2820 = vmatprep.mubr.msk.f32.mxu0 %vm453_vm3, %v1022_v35 }
 0x683   :  { %v1095_v37 = vpop.f32.mrb[10].mxu1 }
 0x684   :  { %v2811_v39 = vpop.f32.mrb[11].mxu1  ;;  %2821 = vmatmul.mubr.msk.f32.vlgmr.msra.gmra.mrb[4].mxu0 %vm453_vm3, %v1095_v37 }
 0x685   :  { %3006 = vmatpush3.bf16.msra.mxu0 %v3003_v2  ;;  %v3023_v2 = vpack.c.bf16 %v1413_v1, %v1412_v63 }
 0x686   :  { %3008 = vmatprep.subr.bf16.mxu0 %v3007_v4 }
 0x689   :  { %3010 = vmatpush3.bf16.msra.mxu0 %v3007_v4  ;;  %v1423_v4 = vld [vmem:[%s4105_s3 + $0x18] sm:$0xff] }
 0x68a   :  { %3012 = vmatprep.subr.bf16.mxu0 %v3011_v7  ;;  %v3039_v5 = vpack.c.bf16 %v1423_v4, %v1422_v3 }
 0x68d   :  { %3014 = vmatpush3.bf16.msra.mxu0 %v3011_v7  ;;  %v1416_v7 = vld [vmem:[%s4106_s12 + $0x8] sm:$0xff] }
 0x68e   :  { %3016 = vmatprep.subr.bf16.mxu0 %v3015_v31 }
 0x691   :  { %3018 = vmatpush3.bf16.msra.mxu0 %v3015_v31 }
 0x692   :  { %3036 = vmatprep.subr.bf16.mxu0 %v3035_v62 }
 0x757   :  { %v2822_v41 = vpop.f32.mrb[4].mxu0 }
 0x758   :  { %v1177_v42 = vpop.f32.mrb[5].mxu0  ;;  %v1183_v34 = vadd.f32 %v2822_v41, %v2593_v40  ;;  %v2601_v41 = vld [vmem:[#allocation14] ss:$0 sm:$0xff] }
 0x759   :  { %v1178_v44 = vadd.f32 %v2593_v40, %v1177_v42 }
 0x75a   :  { %v3903_v16 = vadd.f32 %v1183_v34, %v3817_v28 }
 0x75b   :  { %v3900_v45 = vadd.f32 %v1178_v44, %v3815_v27 }
 0x75c   :  { %v1191_v47 = vsel %vm453_vm3, %v3903_v16, 0.0 }
 0x75d   :  { %v1188_v46 = vsel %vm453_vm3, %v3900_v45, 0.0 }
 0x75e   :  { %1189 = vadd.xlane.f32.xlu1 %v1188_v46 }
 0x762   :  { %1192 = vadd.xlane.f32.xlu1 %v1191_v47 }
 0x7eb   :  { %v1190_v48 = vpop.xlane.xlu1 %1189 }
 0x7ec   :  { %v1194_v0 = vmul.f32 0.03125, %v1190_v48 }
 0x7ee   :  { %v1196_v50 = vsub.f32 %v3900_v45, %v1194_v0 }
 0x7ef   :  { %v1193_v27 = vpop.xlane.xlu1 %1192 }
 0x7f0   :  { %v1195_v51 = vmul.f32 0.03125, %v1193_v27  ;;  %v1198_v28 = vmul.f32 %v1196_v50, %v1196_v50 }
 0x7f2   :  { %v1197_v52 = vsub.f32 %v3903_v16, %v1195_v51  ;;  %v1200_v53 = vsel %vm453_vm3, %v1198_v28, 0.0 }
 0x7f3   :  { %1201 = vadd.xlane.f32.xlu1 %v1200_v53 }
 0x7f4   :  { %v1199_v54 = vmul.f32 %v1197_v52, %v1197_v52 }
 0x7f6   :  { %v1203_v55 = vsel %vm453_vm3, %v1199_v54, 0.0 }
 0x7f7   :  { %1204 = vadd.xlane.f32.xlu1 %v1203_v55 }
 0x880   :  { %v1202_v8 = vpop.xlane.xlu1 %1201 }
 0x881   :  { %v1206_v9 = vmul.f32 0.03125, %v1202_v8  ;;  %v3027_v8 = vpack.c.bf16 %v1416_v7, %v1415_v6 }
 0x883   :  { %v1208_v10 = vadd.f32 1e-05, %v1206_v9 }
 0x884   :  { %v1205_v11 = vpop.xlane.xlu1 %1204 }
 0x885   :  { %3145 = vrsqrt.f32 %v1208_v10  ;;  %v1207_v12 = vmul.f32 0.03125, %v1205_v11 }
 0x887   :  { %v1209_v13 = vadd.f32 1e-05, %v1207_v12 }
 0x889   :  { %3147 = vrsqrt.f32 %v1209_v13 }
 0x88f   :  { %v3146_v14 = vpop.eup %3145 }
 0x890   :  { %v1212_v19 = vmul.f32 %v3146_v14, %v1196_v50 }
 0x892   :  { %v1220_v21 = vmul.f32 %v2596_v18, %v1212_v19  ;;  %v2604_v19 = vld [vmem:[#allocation16] ss:$0 sm:$0xff] }
 0x893   :  { %v3148_v22 = vpop.eup %3147 }
 0x894   :  { %v1213_v23 = vmul.f32 %v3148_v22, %v1197_v52  ;;  %v1228_v24 = vadd.f32 %v2597_v20, %v1220_v21  ;;  %v2605_v21 = vld [vmem:[#allocation17] ss:$0 sm:$0xff] }
 0x896   :  { %v1221_v25 = vmul.f32 %v2596_v18, %v1213_v23  ;;  %2831 = vmatprep.mubr.msk.f32.mxu1 %vm453_vm3, %v1228_v24 }
 0x898   :  { %v1229_v26 = vadd.f32 %v2597_v20, %v1221_v25 }
 0x89a   :  { %2832 = vmatmul.mubr.msk.f32.vlgmr.msra.gmra.mrb[12].mxu1 %vm453_vm3, %v1229_v26  ;;  %v1417_v26 = vld [vmem:[%s4106_s12 + $0x10] sm:$0xff] }
 0x89b   :  { %3022 = vmatpush3.bf16.msra.mxu1 %v3019_v59 }
 0x89c   :  { %3024 = vmatprep.subr.bf16.mxu1 %v3023_v2 }
 0x89f   :  { %3026 = vmatpush3.bf16.msra.mxu1 %v3023_v2 }
 0x8a0   :  { %3028 = vmatprep.subr.bf16.mxu1 %v3027_v8 }
 0x96d   :  { %v2833_v33 = vpop.f32.mrb[12].mxu1 }
 0x96e   :  { %v1314_v35 = vadd.f32 %v2833_v33, %v2598_v32  ;;  %v1308_v36 = vpop.f32.mrb[13].mxu1  ;;  %v2612_v33 = vld [vmem:[%s4107_s17] ss:$0 sm:$0xff] }
 0x96f   :  { %v1309_v37 = vadd.f32 %v2598_v32, %v1308_v36  ;;  %v3031_v32 = vpack.c.bf16 %v1418_v29, %v1417_v26 }
 0x970   :  { %v1318_v40 = vmax.f32 %v1314_v35, 0.0 }
 0x971   :  { %v1317_v39 = vmax.f32 %v1309_v37, 0.0 }
 0x973   :  { %2850 = vmatprep.mubr.msk.f32.mxu0 %vm324_vm0, %v1317_v39 }
 0x974   :  { %2851 = vmatmul.mubr.msk.f32.vlgmr.msra.gmra.mrb[6].mxu0 %vm324_vm0, %v1318_v40 }
 0x975   :  { %3038 = vmatpush3.bf16.msra.mxu0 %v3035_v62 }
 0x976   :  { %3040 = vmatprep.subr.bf16.mxu0 %v3039_v5 }
 0x979   :  { %3042 = vmatpush3.bf16.msra.mxu0 %v3039_v5 }
 0x97a   :  { %2896 = vmatprep.subr.mxu0 %v3532_v15 }
 0xa47   :  { %v2852_v42 = vpop.f32.mrb[6].mxu0 }
 0xa48   :  { %v1397_v34 = vpop.f32.mrb[7].mxu0  ;;  %v1403_v44 = vadd.f32 %v2852_v42, %v2601_v41 }
 0xa49   :  { %v1398_v46 = vadd.f32 %v2601_v41, %v1397_v34  ;;  %v2609_v41 = vld [vmem:[#allocation20] ss:$0 sm:$0xff] }
 0xa4a   :  { %v3933_v48 = vadd.f32 %v1403_v44, %v3903_v16  ;;  %v2606_v44 = vld [vmem:[#allocation19] ss:$0 sm:$0xff] }
 0xa4b   :  { %v3930_v47 = vadd.f32 %v1398_v46, %v3900_v45 }
 0xa4c   :  { %v1449_v50 = vsel %vm453_vm3, %v3933_v48, 0.0 }
 0xa4d   :  { %v1446_v0 = vsel %vm453_vm3, %v3930_v47, 0.0 }
 0xa4e   :  { %1447 = vadd.xlane.f32.xlu1 %v1446_v0 }
 0xa52   :  { %1450 = vadd.xlane.f32.xlu1 %v1449_v50 }
 0xadb   :  { %v1448_v27 = vpop.xlane.xlu1 %1447 }
 0xadc   :  { %v1452_v51 = vmul.f32 0.03125, %v1448_v27 }
 0xade   :  { %v1454_v45 = vsub.f32 %v3930_v47, %v1452_v51 }
 0xadf   :  { %v1451_v28 = vpop.xlane.xlu1 %1450 }
 0xae0   :  { %v1453_v52 = vmul.f32 0.03125, %v1451_v28  ;;  %v1456_v16 = vmul.f32 %v1454_v45, %v1454_v45  ;;  %v1426_v28 = vld [vmem:[%s4108_s10 + $0x8] sm:$0xff] }
 0xae2   :  { %v1455_v53 = vsub.f32 %v3933_v48, %v1453_v52  ;;  %v1458_v54 = vsel %vm453_vm3, %v1456_v16, 0.0 }
 0xae3   :  { %1459 = vadd.xlane.f32.xlu1 %v1458_v54 }
 0xae4   :  { %v1457_v55 = vmul.f32 %v1455_v53, %v1455_v53 }
 0xae6   :  { %v1461_v56 = vsel %vm453_vm3, %v1457_v55, 0.0 }
 0xae7   :  { %1462 = vadd.xlane.f32.xlu0 %v1461_v56 }
 0xb70   :  { %v1460_v9 = vpop.xlane.xlu1 %1459 }
 0xb71   :  { %v1464_v10 = vmul.f32 0.03125, %v1460_v9 }
 0xb73   :  { %v1466_v11 = vadd.f32 1e-05, %v1464_v10 }
 0xb74   :  { %v1463_v12 = vpop.xlane.xlu0 %1462 }
 0xb75   :  { %3149 = vrsqrt.f32 %v1466_v11  ;;  %v1465_v13 = vmul.f32 0.03125, %v1463_v12 }
 0xb77   :  { %v1467_v14 = vadd.f32 1e-05, %v1465_v13 }
 0xb79   :  { %3151 = vrsqrt.f32 %v1467_v14 }
 0xb7f   :  { %v3150_v18 = vpop.eup %3149 }
 0xb80   :  { %v1470_v20 = vmul.f32 %v3150_v18, %v1454_v45  ;;  %v1425_v45 = vld [vmem:[%s4108_s10] sm:$0xff] }
 0xb81   :  { %v3043_v52 = vpack.c.bf16 %v1426_v28, %v1425_v45 }
 0xb82   :  { %v1478_v22 = vmul.f32 %v2604_v19, %v1470_v20 }
 0xb83   :  { %v3152_v23 = vpop.eup %3151 }
 0xb84   :  { %v1471_v24 = vmul.f32 %v3152_v23, %v1455_v53  ;;  %v1486_v25 = vadd.f32 %v2605_v21, %v1478_v22 }
 0xb86   :  { %v1479_v30 = vmul.f32 %v2604_v19, %v1471_v24  ;;  %2861 = vmatprep.mubr.msk.f32.mxu1 %vm453_vm3, %v1486_v25  ;;  %2883 = vmatprep.mubr.msk.f32.mxu0 %vm453_vm3, %v1486_v25 }
 0xb88   :  { %v1487_v31 = vadd.f32 %v2605_v21, %v1479_v30 }
 0xb8a   :  { %2862 = vmatmul.mubr.msk.f32.vlgmr.msra.gmra.mrb[14].mxu1 %vm453_vm3, %v1487_v31  ;;  %2884 = vmatmul.mubr.msk.f32.vlgmr.msra.gmra.mrb[8].mxu0 %vm453_vm3, %v1487_v31 }
 0xb8b   :  { %3030 = vmatpush3.bf16.msra.mxu1 %v3027_v8  ;;  %2872 = vmatprep.mubr.msk.f32.mxu1 %vm453_vm3, %v1486_v25 }
 0xb8c   :  { %3032 = vmatprep.subr.bf16.mxu1 %v3031_v32  ;;  %2898 = vmatprep.mubr.msk.f32.mxu0 %vm3533_vm4, %v3532_v15 }
 0xb8f   :  { %3034 = vmatpush3.bf16.msra.mxu1 %v3031_v32 }
 0xb90   :  { %2886 = vmatprep.subr.mxu1 %v3532_v15 }
 0xb92   :  { %2873 = vmatmul.mubr.msk.f32.vlgmr.msra.gmra.mrb[16].mxu1 %vm453_vm3, %v1487_v31 }
 0xb93   :  { %2888 = vmatprep.mubr.msk.f32.mxu1 %vm3533_vm4, %v3532_v15 }
 0xc5d   :  { %v2863_v35 = vpop.f32.mrb[14].mxu1  ;;  %v2885_v36 = vpop.f32.mrb[8].mxu0 }
 0xc5e   :  { %v1566_v37 = vpop.f32.mrb[15].mxu1  ;;  %v1728_v39 = vpop.f32.mrb[9].mxu0  ;;  %v1572_v27 = vadd.f32 %v2863_v35, %v2606_v44  ;;  %v1734_v51 = vadd.f32 %v2885_v36, %v2612_v33 }
 0xc5f   :  { %v1729_v40 = vadd.f32 %v2612_v33, %v1728_v39  ;;  %v1567_v0 = vadd.f32 %v2606_v44, %v1566_v37  ;;  %v1427_v39 = vld [vmem:[%s4108_s10 + $0x10] sm:$0xff] }
 0xc61   :  { %2897 = vmatpush3.msra.mxu0 %v1729_v40  ;;  %v1428_v40 = vld [vmem:[%s4108_s10 + $0x18] sm:$0xff] }
 0xc62   :  { %3044 = vmatprep.subr.bf16.mxu0 %v3043_v52 }
 0xc65   :  { %v2874_v42 = vpop.f32.mrb[16].mxu1 }
 0xc66   :  { %v1647_v34 = vpop.f32.mrb[17].mxu1  ;;  %v1653_v50 = vadd.f32 %v2874_v42, %v2609_v41 }
 0xc67   :  { %v1648_v46 = vadd.f32 %v2609_v41, %v1647_v34  ;;  %v3047_v41 = vpack.c.bf16 %v1428_v40, %v1427_v39 }
 0xc69   :  { %2887 = vmatpush3.xpose.msk.msra.mxu1 %vm453_vm3, %v1648_v46 }
 0xc6a   :  { %2891 = vmatprep.subr.mxu1 %v3532_v15 }
 0xc6c   :  { %2889 = vmatmul.mubr.msk.f32.vlgmr.msra.gmra.mrb[18].mxu1 %vm453_vm3, %v1567_v0  ;;  %v2621_v0 = vld [vmem:[%s4109_s11] ss:$0 sm:$0xff] }
 0xc6d   :  { %2892 = vmatpush3.xpose.msk.msra.mxu1 %vm453_vm3, %v1653_v50  ;;  %2893 = vmatprep.mubr.msk.f32.mxu1 %vm3533_vm4, %v3532_v15 }
 0xc6e   :  { %2901 = vmatprep.subr.mxu1 %v3532_v15 }
 0xc70   :  { %2894 = vmatmul.mubr.msk.f32.vlgmr.msra.gmra.mrb[20].mxu1 %vm453_vm3, %v1572_v27 }
 0xc71   :  { %2902 = vmatpush3.msra.mxu1 %v1734_v51  ;;  %2903 = vmatprep.mubr.msk.f32.mxu1 %vm3533_vm4, %v3532_v15 }
 0xd3f   :  { %v1809_v16 = vpop.f32.mrb[18].mxu1 }
 0xd40   :  { %v1889_v53 = vmul.f32 0.17677669, %v1809_v16  ;;  %v2890_v54 = vpop.f32.mrb[19].mxu1 }
 0xd42   :  { %v1891_v55 = vsel %vm3875_vm7, -1e+09, %v1889_v53 }
 0xd43   :  { %v1893_v56 = vsel %vm914_vm8, %v1891_v55, -inf  ;;  %v1885_v57 = vpop.f32.mrb[20].mxu1 }
 0xd44   :  { %v1894_v58 = vrot.slane %v1893_v56, 4  ;;  %v1890_v59 = vmul.f32 0.17677669, %v1885_v57  ;;  %v2895_v60 = vpop.f32.mrb[21].mxu1 }
 0xd46   :  { %v1895_v61 = vmax.f32 %v1893_v56, %v1894_v58  ;;  %v1892_v15 = vsel %vm3883_vm9, -1e+09, %v1890_v59 }
 0xd47   :  { %v1900_v62 = vsel %vm914_vm8, %v1892_v15, -inf }
 0xd48   :  { %v1896_v63 = vrot.slane %v1895_v61, 2  ;;  %v1901_v1 = vrot.slane %v1900_v62, 4 }
 0xd4a   :  { %v1897_v2 = vmax.f32 %v1895_v61, %v1896_v63  ;;  %v1902_v3 = vmax.f32 %v1900_v62, %v1901_v1  ;;  %v1433_v62 = vld [vmem:[%s4110_s4 + $0x8] sm:$0xff]  ;;  %v1434_v1 = vld [vmem:[%s4110_s4 + $0x10] sm:$0xff] }
 0xd4c   :  { %v1898_v4 = vrot.slane %v1897_v2, 1  ;;  %v1903_v5 = vrot.slane %v1902_v3, 2 }
 0xd4e   :  { %v1899_v43 = vmax.f32 %v1897_v2, %v1898_v4  ;;  %v1904_v6 = vmax.f32 %v1902_v3, %v1903_v5  ;;  %v1435_v2 = vld [vmem:[%s4110_s4 + $0x18] sm:$0xff]  ;;  %v1437_v4 = vld [vmem:[%s4111_s15] sm:$0xff]  ;;  %v1438_v5 = vld [vmem:[%s4111_s15 + $0x8] sm:$0xff] }
 0xd4f   :  { %v3055_v3 = vpack.c.bf16 %v1435_v2, %v1434_v1 }
 0xd50   :  { %v1907_v7 = vsub.f32 %v1891_v55, %v1899_v43  ;;  %v1905_v8 = vrot.slane %v1904_v6, 1  ;;  %v1439_v43 = vld [vmem:[%s4111_s15 + $0x10] sm:$0xff] }
 0xd52   :  { %v1909_v9 = vmul.f32 1.442695, %v1907_v7  ;;  %v1906_v10 = vmax.f32 %v1904_v6, %v1905_v8  ;;  %v3059_v6 = vpack.c.bf16 %v1438_v5, %v1437_v4  ;;  %v1440_v7 = vld [vmem:[%s4111_s15 + $0x18] sm:$0xff] }
 0xd53   :  { %v3063_v8 = vpack.c.bf16 %v1440_v7, %v1439_v43 }
 0xd54   :  { %3153 = vpow2.f32 %v1909_v9  ;;  %v1908_v11 = vsub.f32 %v1892_v15, %v1906_v10  ;;  %v1432_v15 = vld [vmem:[%s4110_s4] sm:$0xff]  ;;  %v1442_v10 = vld [vmem:[%s4111_s15 + $0x28] sm:$0xff] }
 0xd55   :  { %v3051_v63 = vpack.c.bf16 %v1433_v62, %v1432_v15  ;;  %v1441_v9 = vld [vmem:[%s4111_s15 + $0x20] sm:$0xff] }
 0xd56   :  { %v1911_v12 = vmul.f32 1.442695, %v1908_v11  ;;  %v3067_v11 = vpack.c.bf16 %v1442_v10, %v1441_v9 }
 0xd57   :  { %3052 = vmatprep.subr.bf16.mxu1 %v3051_v63 }
 0xd58   :  { %3155 = vpow2.f32 %v1911_v12 }
 0xd5e   :  { %v3154_v49 = vpop.eup %3153 }
 0xd5f   :  { %v1913_v13 = vsel %vm914_vm8, %v3154_v49, 0.0 }
 0xd60   :  { %v1914_v14 = vrot.slane %v1913_v13, 4 }
 0xd62   :  { %v3156_v18 = vpop.eup %3155  ;;  %v1915_v19 = vadd.f32 %v1914_v14, %v1913_v13 }
 0xd63   :  { %v1920_v20 = vsel %vm914_vm8, %v3156_v18, 0.0 }
 0xd64   :  { %v1916_v21 = vrot.slane %v1915_v19, 2  ;;  %v1921_v22 = vrot.slane %v1920_v20, 4 }
 0xd66   :  { %v1917_v23 = vadd.f32 %v1916_v21, %v1915_v19  ;;  %v1922_v24 = vadd.f32 %v1921_v22, %v1920_v20  ;;  %v2624_v21 = vld [vmem:[%s4112_s16] ss:$0 sm:$0xff] }
 0xd68   :  { %v1918_v25 = vrot.slane %v1917_v23, 1  ;;  %v1923_v26 = vrot.slane %v1922_v24, 2 }
 0xd6a   :  { %v1919_v29 = vadd.f32 %v1918_v25, %v1917_v23  ;;  %v1924_v30 = vadd.f32 %v1923_v26, %v1922_v24  ;;  %v2625_v25 = vld [vmem:[%s4113_s6] ss:$0 sm:$0xff] }
 0xd6c   :  { %3157 = vrcp.f32 %v1919_v29  ;;  %v1925_v31 = vrot.slane %v1924_v30, 1 }
 0xd6e   :  { %v1926_v32 = vadd.f32 %v1925_v31, %v1924_v30 }
 0xd70   :  { %3159 = vrcp.f32 %v1926_v32  ;;  %v1443_v32 = vld [vmem:[%s4111_s15 + $0x30] sm:$0xff] }
 0xd76   :  { %v3158_v33 = vpop.eup %3157 }
 0xd77   :  { %v1929_v35 = vmul.f32 %v3158_v33, %v3154_v49  ;;  %v1444_v33 = vld [vmem:[%s4111_s15 + $0x38] sm:$0xff] }
 0xd79   :  { %2899 = vmatmul.mubr.msk.f32.vlgmr.msra.gmra.mrb[10].mxu0 %vm914_vm8, %v1929_v35  ;;  %v3071_v35 = vpack.c.bf16 %v1444_v33, %v1443_v32 }
 0xd7a   :  { %v3160_v36 = vpop.eup %3159  ;;  %3046 = vmatpush3.bf16.msra.mxu0 %v3043_v52 }
 0xd7b   :  { %v1930_v37 = vmul.f32 %v3160_v36, %v3156_v18  ;;  %3048 = vmatprep.subr.bf16.mxu0 %v3047_v41  ;;  %v2626_v36 = vld [vmem:[%s4114_s18] ss:$0 sm:$0xff] }
 0xd7d   :  { %2904 = vmatmul.mubr.msk.f32.vlgmr.msra.gmra.mrb[22].mxu1 %vm914_vm8, %v1930_v37 }
 0xd7e   :  { %3050 = vmatpush3.bf16.msra.mxu0 %v3047_v41  ;;  %3054 = vmatpush3.bf16.msra.mxu1 %v3051_v63 }
 0xd7f   :  { %3056 = vmatprep.subr.bf16.mxu1 %v3055_v3  ;;  %3060 = vmatprep.subr.bf16.mxu0 %v3059_v6 }
 0xd82   :  { %3058 = vmatpush3.bf16.msra.mxu1 %v3055_v3 }
 0xe4c   :  { %v2000_v42 = vpop.f32.mrb[10].mxu0 }
 0xe4d   :  { %v2900_v34 = vpop.f32.mrb[11].mxu0  ;;  %2914 = vmatprep.mubr.msk.f32.mxu0 %vm453_vm3, %v2000_v42 }
 0xe50   :  { %v2073_v44 = vpop.f32.mrb[22].mxu1 }
 0xe51   :  { %v2905_v46 = vpop.f32.mrb[23].mxu1  ;;  %2915 = vmatmul.mubr.msk.f32.vlgmr.msra.gmra.mrb[12].mxu0 %vm453_vm3, %v2073_v44  ;;  %v2629_v44 = vld [vmem:[%s3718_s8] ss:$0 sm:$0xff] }
 0xe52   :  { %3062 = vmatpush3.bf16.msra.mxu0 %v3059_v6 }
 0xe53   :  { %3064 = vmatprep.subr.bf16.mxu0 %v3063_v8 }
 0xe56   :  { %3066 = vmatpush3.bf16.msra.mxu0 %v3063_v8 }
 0xe57   :  { %3068 = vmatprep.subr.bf16.mxu0 %v3067_v11 }
 0xe5a   :  { %3070 = vmatpush3.bf16.msra.mxu0 %v3067_v11 }
 0xe5b   :  { %3072 = vmatprep.subr.bf16.mxu0 %v3071_v35 }
 0xe5e   :  { %3074 = vmatpush3.bf16.msra.mxu0 %v3071_v35 }
 0xf24   :  { %v2916_v50 = vpop.f32.mrb[12].mxu0 }
 0xf25   :  { %v2161_v27 = vadd.f32 %v2916_v50, %v2621_v0  ;;  %v2155_v51 = vpop.f32.mrb[13].mxu0 }
 0xf26   :  { %v2156_v45 = vadd.f32 %v2621_v0, %v2155_v51  ;;  %v2632_v51 = vld [vmem:[%s3723_s25 + $0x8] sm:$0xff] }
 0xf27   :  { %v3996_v28 = vadd.f32 %v2161_v27, %v3933_v48  ;;  %v2386_v27 = vld [vmem:[%s3723_s25] sm:$0xff]  ;;  %s3534_s25 = smov [#allocation22]  }
 0xf28   :  { %v3999_v52 = vadd.f32 %v2156_v45, %v3930_v47 }
 0xf29   :  { %v2169_v16 = vsel %vm453_vm3, %v3996_v28, 0.0 }
 0xf2a   :  { %2170 = vadd.xlane.f32.xlu0 %v2169_v16  ;;  %v2166_v53 = vsel %vm453_vm3, %v3999_v52, 0.0 }
 0xf2b   :  { %2167 = vadd.xlane.f32.xlu1 %v2166_v53 }
 0xfb7   :  { %v2171_v54 = vpop.xlane.xlu0 %2170 }
 0xfb8   :  { %v2173_v55 = vmul.f32 0.03125, %v2171_v54  ;;  %v2168_v56 = vpop.xlane.xlu1 %2167 }
 0xfb9   :  { %v2172_v48 = vmul.f32 0.03125, %v2168_v56 }
 0xfba   :  { %v2175_v57 = vsub.f32 %v3996_v28, %v2173_v55 }
 0xfbb   :  { %v2174_v47 = vsub.f32 %v3999_v52, %v2172_v48 }
 0xfbc   :  { %v2177_v58 = vmul.f32 %v2175_v57, %v2175_v57 }
 0xfbd   :  { %v2176_v59 = vmul.f32 %v2174_v47, %v2174_v47 }
 0xfbe   :  { %v2181_v60 = vsel %vm453_vm3, %v2177_v58, 0.0 }
 0xfbf   :  { %2182 = vadd.xlane.f32.xlu0 %v2181_v60  ;;  %v2178_v61 = vsel %vm453_vm3, %v2176_v59, 0.0 }
 0xfc0   :  { %2179 = vadd.xlane.f32.xlu1 %v2178_v61 }
0x104c   :  { %v2183_v12 = vpop.xlane.xlu0 %2182 }
0x104d   :  { %v2185_v49 = vmul.f32 0.03125, %v2183_v12  ;;  %v2180_v13 = vpop.xlane.xlu1 %2179 }
0x104e   :  { %v2184_v14 = vmul.f32 0.03125, %v2180_v13 }
0x104f   :  { %v2187_v18 = vadd.f32 1e-05, %v2185_v49 }
0x1050   :  { %v2186_v19 = vadd.f32 1e-05, %v2184_v14 }
0x1051   :  { %3161 = vrsqrt.f32 %v2187_v18 }
0x1052   :  { %3163 = vrsqrt.f32 %v2186_v19 }
0x105b   :  { %v3162_v20 = vpop.eup %3161 }
0x105c   :  { %v3164_v22 = vpop.eup %3163  ;;  %v2191_v23 = vmul.f32 %v3162_v20, %v2175_v57 }
0x105d   :  { %v2190_v24 = vmul.f32 %v3164_v22, %v2174_v47 }
0x105e   :  { %v2199_v26 = vmul.f32 %v2624_v21, %v2191_v23 }
0x105f   :  { %v2198_v29 = vmul.f32 %v2624_v21, %v2190_v24 }
0x1060   :  { %v2207_v31 = vadd.f32 %v2625_v25, %v2199_v26  ;;  %v2633_v26 = vld [vmem:[%s3728_s29 + $0x1] sm:$0x1] }
0x1061   :  { %v2206_v30 = vadd.f32 %v2625_v25, %v2198_v29  ;;  %v2409_v25 = vld [vmem:[%s3728_s29] sm:$0x1]  ;;  %s2516_s29 = sshll.u32 %s3534_s25, 4  ;;  %s2517_s29 = int_to_ptr.vmem [resolvable:$true] %s2516_s29 }
0x1062   :  { %s3441_s8 = scalar_lea.vmem %s2517_s29, 32  ;;  %p3446_p13 = scmp.lt.s32.totalorder %s2517_s29, %s2517_s29 }
0x1063   :  { %2925 = vmatprep.mubr.msk.f32.mxu1 %vm453_vm3, %v2206_v30  ;;  %p3442_p12 = scmp.ne.s32.totalorder %s2517_s29, %s3441_s8  ;;  %p3447_p0 = scmp.lt.s32.totalorder %s3441_s8, %s3441_s8 }
0x1064   :  { %2926 = vmatmul.mubr.msk.f32.vlgmr.msra.gmra.mrb[24].mxu1 %vm453_vm3, %v2207_v31 }
0x1065   :  { %p3448_p1 = por %p3447_p0, %p3446_p13 }
0x1067   :  { %p3449_p2 = pnand %p3448_p1, %p3442_p12 }
0x1137   :  { %v2927_v37 = vpop.f32.mrb[24].mxu1 }
0x1138   :  { %v2292_v39 = vadd.f32 %v2927_v37, %v2626_v36  ;;  %v2286_v40 = vpop.f32.mrb[25].mxu1 }
0x1139   :  { %v2287_v41 = vadd.f32 %v2626_v36, %v2286_v40 }
0x113a   :  { %v2296_v34 = vmax.f32 %v2292_v39, 0.0 }
0x113b   :  { %v2295_v42 = vmax.f32 %v2287_v41, 0.0 }
0x113d   :  { %2944 = vmatprep.mubr.msk.f32.mxu0 %vm324_vm0, %v2295_v42 }
0x113e   :  { %2945 = vmatmul.mubr.msk.f32.vlgmr.msra.gmra.mrb[14].mxu0 %vm324_vm0, %v2296_v34 }
0x1211   :  { %v2946_v46 = vpop.f32.mrb[14].mxu0 }
0x1212   :  { %v2381_v0 = vadd.f32 %v2946_v46, %v2629_v44  ;;  %v2375_v50 = vpop.f32.mrb[15].mxu0 }
0x1213   :  { %v2376_v45 = vadd.f32 %v2629_v44, %v2375_v50 }
0x1214   :  { %v2385_v16 = vadd.f32 %v2381_v0, %v3996_v28 }
0x1215   :  { %v2384_v53 = vadd.f32 %v2376_v45, %v3999_v52 }
0x1216   :  { %v2388_v54 = vmul.f32 %v2386_v27, %v2385_v16  ;;  %v2415_v55 = vmul.f32 %v2632_v51, %v2385_v16 }
0x1217   :  { %v2387_v56 = vmul.f32 %v2386_v27, %v2384_v53  ;;  %v2414_v48 = vmul.f32 %v2632_v51, %v2384_v53 }
0x1218   :  { %v2396_v57 = vsel %vm453_vm3, %v2388_v54, 0.0  ;;  %v2423_v47 = vsel %vm453_vm3, %v2415_v55, 0.0 }
0x1219   :  { %v2397_v58 = vrot.slane %v2396_v57, 4  ;;  %v2424_v59 = vrot.slane %v2423_v47, 4  ;;  %v2389_v60 = vsel %vm453_vm3, %v2387_v56, 0.0  ;;  %v2416_v61 = vsel %vm453_vm3, %v2414_v48, 0.0 }
0x121a   :  { %v2390_v15 = vrot.slane %v2389_v60, 4  ;;  %v2417_v62 = vrot.slane %v2416_v61, 4 }
0x121b   :  { %v2398_v63 = vadd.f32 %v2397_v58, %v2396_v57  ;;  %v2425_v28 = vadd.f32 %v2424_v59, %v2423_v47 }
0x121c   :  { %v2391_v1 = vadd.f32 %v2390_v15, %v2389_v60  ;;  %v2418_v52 = vadd.f32 %v2417_v62, %v2416_v61 }
0x121d   :  { %v2399_v2 = vrot.slane %v2398_v63, 2  ;;  %v2426_v3 = vrot.slane %v2425_v28, 2 }
0x121e   :  { %v2392_v4 = vrot.slane %v2391_v1, 2  ;;  %v2419_v5 = vrot.slane %v2418_v52, 2 }
0x121f   :  { %v2400_v43 = vadd.f32 %v2399_v2, %v2398_v63  ;;  %v2427_v6 = vadd.f32 %v2426_v3, %v2425_v28 }
0x1220   :  { %v2393_v7 = vadd.f32 %v2392_v4, %v2391_v1  ;;  %v2420_v8 = vadd.f32 %v2419_v5, %v2418_v52 }
0x1221   :  { %v2401_v9 = vrot.slane %v2400_v43, 1  ;;  %v2428_v10 = vrot.slane %v2427_v6, 1 }
0x1222   :  { %v2394_v11 = vrot.slane %v2393_v7, 1  ;;  %v2421_v12 = vrot.slane %v2420_v8, 1 }
0x1223   :  { %v2402_v49 = vadd.f32 %v2401_v9, %v2400_v43  ;;  %v2429_v18 = vadd.f32 %v2428_v10, %v2427_v6 }
0x1224   :  { %v2395_v13 = vadd.f32 %v2394_v11, %v2393_v7  ;;  %v2422_v20 = vadd.f32 %v2421_v12, %v2420_v8 }
0x1225   :  { %v2406_v14 = vsel %vm453_vm3, %v2402_v49, 0.0  ;;  %v2433_v21 = vsel %vm453_vm3, %v2429_v18, 0.0 }
0x1226   :  { %2407 = vadd.xlane.f32.xlu0 %v2406_v14  ;;  %v2403_v19 = vsel %vm453_vm3, %v2395_v13, 0.0  ;;  %v2430_v22 = vsel %vm453_vm3, %v2422_v20, 0.0 }
0x1227   :  { %2404 = vadd.xlane.f32.xlu1 %v2403_v19 }
0x122a   :  { %2434 = vadd.xlane.f32.xlu0 %v2433_v21 }
0x122b   :  { %2431 = vadd.xlane.f32.xlu1 %v2430_v22 }
0x12b3   :  { %v2408_v23 = vpop.xlane.xlu0 %2407 }
0x12b4   :  { %v2405_v24 = vpop.xlane.xlu1 %2404  ;;  %v2411_v30 = vadd.f32 %v2409_v25, %v2408_v23 }
0x12b5   :  { %v2410_v33 = vadd.f32 %v2409_v25, %v2405_v24 }
0x12b7   :  { %v2435_v29 = vpop.xlane.xlu0 %2434 }
0x12b8   :  { %v2439_v31 = vadd.f32 %v2633_v26, %v2435_v29  ;;  %v2432_v32 = vpop.xlane.xlu1 %2431 }
0x12b9   :  { %v2438_v35 = vadd.f32 %v2633_v26, %v2432_v32 }
0x12ba   :  { %v2441_v36 = vmax.f32 %v2411_v30, %v2439_v31 }
0x12bb   :  { %v2440_v37 = vmax.f32 %v2410_v33, %v2438_v35 }
0x12bc   :  { %v2443_v39 = vsub.f32 %v2411_v30, %v2441_v36  ;;  %v2449_v40 = vsub.f32 %v2439_v31, %v2441_v36 }
0x12bd   :  { %v2442_v41 = vsub.f32 %v2410_v33, %v2440_v37  ;;  %v2448_v42 = vsub.f32 %v2438_v35, %v2440_v37 }
0x12be   :  { %v2446_v34 = vmul.f32 1.442695, %v2443_v39  ;;  %v2452_v44 = vmul.f32 1.442695, %v2449_v40 }
0x12bf   :  { %v2444_v46 = vmul.f32 1.442695, %v2442_v41  ;;  %v2450_v0 = vmul.f32 1.442695, %v2448_v42 }
0x12c0   :  { %3165 = vpow2.f32 %v2446_v34 }
0x12c1   :  { %3167 = vpow2.f32 %v2452_v44 }
0x12c2   :  { %3169 = vpow2.f32 %v2444_v46 }
0x12c3   :  { %3171 = vpow2.f32 %v2450_v0 }
0x12ca   :  { %v3166_v50 = vpop.eup %3165 }
0x12cb   :  { %v3168_v27 = vpop.eup %3167 }
0x12cc   :  { %v3170_v51 = vpop.eup %3169  ;;  %v2455_v45 = vadd.f32 %v3168_v27, %v3166_v50 }
0x12cd   :  { %v3172_v16 = vpop.eup %3171 }
0x12ce   :  { %v2454_v53 = vadd.f32 %v3172_v16, %v3170_v51  ;;  %3173 = vrcp.f32 %v2455_v45 }
0x12d0   :  { %3175 = vrcp.f32 %v2454_v53 }
0x12d8   :  { %v3174_v54 = vpop.eup %3173 }
0x12d9   :  { %v2460_v55 = vmul.f32 %v3174_v54, %v3166_v50  ;;  %v2485_v47 = vmul.f32 %v3174_v54, %v3168_v27 }
0x12da   :  { %v3176_v56 = vpop.eup %3175 }
0x12db   :  { %2472 = vperm.xlu0 %3131, %v2460_v55   ;;  %v2459_v48 = vmul.f32 %v3176_v56, %v3170_v51  ;;  %v2484_v57 = vmul.f32 %v3176_v56, %v3172_v16 }
0x12dd   :  { %2463 = vperm.xlu1 %3132, %v2459_v48  }
0x12e1   :  { %2488 = vperm.xlu1 %3132, %v2484_v57  }
0x12e5   :  { %2497 = vperm.xlu1 %3132, %v2485_v47  }
0x135a   :  { %v2473_v60 = vpop.permute.xlu0 %2472 }
0x135b   :  { %v2478_v62 = vrot.slane %v2473_v60, %v3870_v38 }
0x135c   :  { %v2464_v58 = vpop.permute.xlu1 %2463 }
0x135d   :  { %v2469_v59 = vrot.slane %v2464_v58, %v3870_v38  ;;  %v2480_v3 = vsel %vm2458_vm10, %v2478_v62, 0.0 }
0x135f   :  { %v2479_v63 = vsel %vm2458_vm10, %v2469_v59, 0.0 }
0x1360   :  { %v2489_v61 = vpop.permute.xlu1 %2488 }
0x1361   :  { %v2494_v15 = vrot.slane %v2489_v61, %v3870_v38 }
0x1363   :  { %v2504_v28 = vsel %vm2483_vm11, %v2494_v15, 0.0 }
0x1364   :  { %v2506_v1 = vadd.f32 %v2504_v28, %v2479_v63  ;;  %v2498_v52 = vpop.permute.xlu1 %2497 }
0x1365   :  { %v2503_v2 = vrot.slane %v2498_v52, %v3870_v38 }
0x1366   :  { %2509 = vst.msk [vmem:[#allocation22] sm:$0x1] %vm2508_vm12, %v2506_v1 }
0x1367   :  { %v2505_v4 = vsel %vm2483_vm11, %v2503_v2, 0.0 }
0x1368   :  { %v2507_v5 = vadd.f32 %v2505_v4, %v2480_v3 }
0x136a   :  { %2510 = vst.msk [vmem:[#allocation22 + $0x1] sm:$0x1] %vm2508_vm12, %v2507_v5 }
0x136b   :  { %3452 = shalt.err (!%p3449_p2)
}
0x136c   :  { %s3453_s22 = scalar_lea.hbm %s3733_s30, 32 }
0x136d   :  { %p3454_p3 = scmp.ne.s32.totalorder %s3733_s30, %s3453_s22  ;;  %p3457_p4 = scmp.lt.u32.totalorder %s3453_s22, %s3733_s30 }
0x136f   :  { %p3459_p5 = pnand %p3457_p4, %p3454_p3 }
0x1371   :  { %3462 = shalt.err (!%p3459_p5)
}
0x1372   :  { %2522 = dma.vmem_to_hbm [thread:$0]  %s2517_s29, 32, %s3733_s30, [#allocation4], %s3523_s7, %s3523_s7, %s3524_s14  }
0x1373   :  { %3477 = dma.done.wait [#allocation4], 32  }
0x1374   :  { %3478 = vsyncadd [#allocation4], 4294967264 }
0x1375   :  { %2526 = vsyncpa [#allocation3], 1 }
0x1376   :  { %2527 = vsyncpa [#allocation6], 1 }
0x1377   :  { %2528 = vsyncpa [#allocation9], 1 }
0x1378   :  { %2529 = vsyncpa [#allocation12], 1 }
0x1379   :  { %2530 = vsyncpa [#allocation15], 1 }
0x137a   :  { %2531 = vsyncpa [#allocation18], 1 }
0x137b   :  { %2532 = vsyncpa [#allocation21], 1 }
0x137c   :  { %2533 = vsyncpa [#allocation4], 1 }

</bundles_post_ra>
